<compile_context>
chip_gen: v7x
topology: tpu7x:2x2x1
jax: 0.10.0
libtpu: 0.0.40
codegen_flags: <defaults>
</compile_context>

<pallas_src>
import functools
import math

import numpy as np

import jax
import jax.numpy as jnp
from jax.experimental import pallas as pl
from jax.experimental.pallas import tpu as pltpu

EPS = 1e-5
LANE = 128
_REFS_PER_LAYER = 4  # wcat, bias, gamma, beta


def _round_up(x, m):
    return (x + m - 1) // m * m


def _erf_approx(x):
    """Abramowitz & Stegun 7.1.26, |err| < 1.5e-7.  Uses only exp/mul/add/select so it
    lowers cleanly in Mosaic (no dependence on an erf primitive)."""
    p = 0.3275911
    a1, a2, a3, a4, a5 = (0.254829592, -0.284496736, 1.421413741,
                          -1.453152027, 1.061405429)
    ax = jnp.abs(x)
    t = 1.0 / (1.0 + p * ax)
    poly = ((((a5 * t + a4) * t + a3) * t + a2) * t + a1) * t
    y = 1.0 - poly * jnp.exp(-ax * ax)
    return jnp.where(x >= 0, y, -y)


def _gelu_exact(x):
    """Exact (erf) GELU == torch.nn.GELU() to ~1e-7."""
    return 0.5 * x * (1.0 + _erf_approx(x * 0.7071067811865476))


# ---------------------------------------------------------------------------
# Fused kernel: all TCN blocks + head in one pallas_call (activations stay in VMEM)
# ---------------------------------------------------------------------------
def _fused_tcn_kernel(num_layers, dilations, t_outs, slot, off, inv_counts,
                      inv_t_final, batch, *refs):
    """refs = [x_slab, (wcat, bias, gamma, beta) * num_layers, wfc, bfc, out_ref]."""
    x_ref = refs[0]
    wfc_ref = refs[1 + _REFS_PER_LAYER * num_layers]
    bfc_ref = refs[2 + _REFS_PER_LAYER * num_layers]
    o_ref = refs[-1]

    rows = x_ref.shape[0]
    h = x_ref[...]                                             # [rows, Cin_pad] f32

    for i in range(num_layers):
        d = dilations[i]
        t_out = t_outs[i]
        base = 1 + _REFS_PER_LAYER * i
        wcat_ref, b_ref, g_ref, beta_ref = refs[base:base + _REFS_PER_LAYER]
        cpad = wcat_ref.shape[1]

        # Dilated Conv1d(kernel_size=2):
        #   y[r] = W0 @ h[r - d] + W1 @ h[r] + bias
        # The shifted tap is an XLU sublane roll (wrap hits guaranteed-zero pad rows);
        # both taps are fused into ONE K = 2*Cin_pad bf16 MXU matmul against [W0; W1].
        h_shift = pltpu.roll(h, shift=d, axis=0)
        h2 = jnp.concatenate([h_shift, h], axis=-1).astype(jnp.bfloat16)
        y = (jnp.dot(h2, wcat_ref[...], preferred_element_type=jnp.float32)
             + b_ref[...])                                     # [rows, C_pad] f32

        # Valid-row mask built in-kernel (no DMA): rows [off, off + t_out) of each slot.
        pos = jax.lax.broadcasted_iota(jnp.int32, (rows, cpad), 0) % slot
        mask = ((pos >= off) & (pos < off + t_out)).astype(jnp.float32)

        # BatchNorm1d, training mode: biased stats over the B*t_out valid rows only,
        # single pass (sum / sum-of-squares) accumulated in f32.
        ym = y * mask
        mean = jnp.sum(ym, axis=0, keepdims=True) * inv_counts[i]       # [1, C_pad]
        ex2 = jnp.sum(y * ym, axis=0, keepdims=True) * inv_counts[i]
        var = jnp.maximum(ex2 - mean * mean, 0.0)
        z = (y - mean) * jax.lax.rsqrt(var + EPS) * g_ref[...] + beta_ref[...]

        # Exact (erf) GELU; re-mask so padding rows stay exactly zero for the next
        # layer's rolled tap (and padded channels stay zero: gamma/beta/bias pads are 0).
        h = _gelu_exact(z) * mask

    # Head: per-sample mean over time as an in-kernel reduction over the slot axis
    # (padding rows already zero), then the Linear layer.  Kept in f32 (tiny).
    cpad = h.shape[-1]
    pooled = jnp.sum(h.reshape(batch, slot, cpad), axis=1) * inv_t_final   # [B, C_pad]
    o_ref[...] = (jnp.dot(pooled, wfc_ref[...], preferred_element_type=jnp.float32)
                  + bfc_ref[...])


# ---------------------------------------------------------------------------
# Forward wrapper: builds the lane-dense slab + trace-time constants, one pallas_call
# ---------------------------------------------------------------------------
def tcn_forward(x_nct, packed):
    """x_nct: [batch, features, time_steps] (PyTorch NCT) -> [batch, output_dim]."""
    B, cin, t0 = x_nct.shape
    blocks = packed["blocks"]
    num_layers = len(blocks)
    dilations = [2 ** i for i in range(num_layers)]

    # Temporal geometry: layer i maps length T -> T + dilation_i (Conv1d padding=d).
    t_lens = [t0]
    for d in dilations:
        t_lens.append(t_lens[-1] + d)
    t_final = t_lens[-1]
    off = max(8, _round_up(max(dilations), 8))     # guaranteed-zero rows before each sample
    slot = _round_up(off + t_final, 8)             # rows per batch sample in the slab
    rows = B * slot
    cin_pad = _round_up(cin, LANE)

    # Input slab [rows, cin_pad] f32; sample b occupies rows [b*slot+off, b*slot+off+t0).
    xt = jnp.transpose(x_nct, (0, 2, 1))                                  # [B, T, Cin]
    xt = jnp.pad(xt, ((0, 0), (off, slot - off - t0), (0, cin_pad - cin)))
    x_slab = xt.reshape(rows, cin_pad).astype(jnp.float32)

    args = [x_slab]
    inv_counts, t_outs = [], []
    for i, blk in enumerate(blocks):
        t_out = t_lens[i + 1]
        t_outs.append(t_out)
        inv_counts.append(1.0 / float(B * t_out))
        args += [blk["wcat"], blk["b"], blk["gamma"], blk["beta"]]
    args += [packed["wfc"], packed["bfc"]]

    dout_pad = packed["wfc"].shape[1]
    kernel = functools.partial(
        _fused_tcn_kernel, num_layers, tuple(dilations), tuple(t_outs),
        slot, off, tuple(inv_counts), 1.0 / float(t_final), B)

    out = pl.pallas_call(
        kernel,
        out_shape=jax.ShapeDtypeStruct((B, dout_pad), jnp.float32),
        in_specs=[pl.BlockSpec(memory_space=pltpu.MemorySpace.VMEM)] * len(args),
        out_specs=pl.BlockSpec(memory_space=pltpu.MemorySpace.VMEM),
        compiler_params=pltpu.CompilerParams(vmem_limit_bytes=32 * 1024 * 1024),
    )(*args)
    return out[:, :packed["out_dim"]]


# ---------------------------------------------------------------------------
# Parameter init (mirrors the nn.Module __init__) and one-time packing
# ---------------------------------------------------------------------------
def init_params(key, input_dim, output_dim, num_channels, num_layers):
    blocks = []
    for i in range(num_layers):
        cin = input_dim if i == 0 else num_channels
        key, k1, k2 = jax.random.split(key, 3)
        bound = 1.0 / math.sqrt(cin * 2)
        w = jax.random.uniform(k1, (num_channels, cin, 2), jnp.float32, -bound, bound)
        b = jax.random.uniform(k2, (num_channels,), jnp.float32, -bound, bound)
        blocks.append(dict(w=w, b=b,
                           gamma=jnp.ones((num_channels,), jnp.float32),
                           beta=jnp.zeros((num_channels,), jnp.float32)))
    key, k1, k2 = jax.random.split(key, 3)
    bound = 1.0 / math.sqrt(num_channels)
    fc_w = jax.random.uniform(k1, (output_dim, num_channels), jnp.float32, -bound, bound)
    fc_b = jax.random.uniform(k2, (output_dim,), jnp.float32, -bound, bound)
    return dict(blocks=blocks, fc_w=fc_w, fc_b=fc_b)


def pack_params(params, lane=LANE):
    """Pad channels to 128 lanes, stack both conv taps along the K axis ([W0; W1], so a
    single K=2*Cin_pad matmul per layer), cast conv weights to bf16 once.  gamma/beta/
    bias pads are zero so padded channels stay exactly zero through the network."""
    packed_blocks = []
    for blk in params["blocks"]:
        w = np.asarray(blk["w"], np.float32)          # [Cout, Cin, 2]
        cout, cin, _ = w.shape
        cin_p, cout_p = _round_up(cin, lane), _round_up(cout, lane)
        wcat = np.zeros((2 * cin_p, cout_p), np.float32)
        wcat[:cin, :cout] = w[:, :, 0].T              # tap 0 -> multiplies rolled h
        wcat[cin_p:cin_p + cin, :cout] = w[:, :, 1].T # tap 1 -> multiplies h
        b = np.zeros((1, cout_p), np.float32);  b[0, :cout] = np.asarray(blk["b"])
        g = np.zeros((1, cout_p), np.float32);  g[0, :cout] = np.asarray(blk["gamma"])
        be = np.zeros((1, cout_p), np.float32); be[0, :cout] = np.asarray(blk["beta"])
        packed_blocks.append(dict(
            wcat=jnp.asarray(wcat, jnp.bfloat16),
            b=jnp.asarray(b), gamma=jnp.asarray(g), beta=jnp.asarray(be)))
    fc_w = np.asarray(params["fc_w"], np.float32)     # [Dout, C]
    dout, c = fc_w.shape
    c_p, dout_p = _round_up(c, lane), _round_up(dout, lane)
    wfc = np.zeros((c_p, dout_p), np.float32); wfc[:c, :dout] = fc_w.T
    bfc = np.zeros((1, dout_p), np.float32);   bfc[0, :dout] = np.asarray(params["fc_b"])
    return dict(blocks=packed_blocks, wfc=jnp.asarray(wfc), bfc=jnp.asarray(bfc),
                out_dim=dout)


# ---------------------------------------------------------------------------
# Pure-JAX reference (PyTorch semantics).  matmul_dtype=bfloat16 mirrors the kernel's
# mixed-precision conv matmuls (f32 accumulation, f32 BN/GELU/head).
# ---------------------------------------------------------------------------
def tcn_reference(x_nct, params, matmul_dtype=jnp.float32):
    def mm(a, w):
        return jnp.dot(a.astype(matmul_dtype), w.astype(matmul_dtype),
                       preferred_element_type=jnp.float32)

    h = jnp.transpose(x_nct, (0, 2, 1)).astype(jnp.float32)
    for i, blk in enumerate(params["blocks"]):
        d = 2 ** i
        t_out = h.shape[1] + d
        xp = jnp.pad(h, ((0, 0), (d, d), (0, 0)))
        x0 = xp[:, 0:t_out, :]
        x1 = xp[:, d:d + t_out, :]
        y = mm(x0, blk["w"][:, :, 0].T) + mm(x1, blk["w"][:, :, 1].T) + blk["b"]
        mean = jnp.mean(y, axis=(0, 1), keepdims=True)
        var = jnp.mean((y - mean) ** 2, axis=(0, 1), keepdims=True)
        z = (y - mean) / jnp.sqrt(var + EPS) * blk["gamma"] + blk["beta"]
        h = jax.nn.gelu(z, approximate=False)
    m = jnp.mean(h, axis=1)
    return jnp.dot(m, params["fc_w"].T) + params["fc_b"]


if __name__ == "__main__":
    BATCH, INPUT_DIM, SEQ_LEN = 2, 4, 16
    NUM_CHANNELS, OUTPUT_DIM, NUM_LAYERS = 32, 8, 3

    key = jax.random.PRNGKey(0)
    kx, kp = jax.random.split(key)
    x = jax.random.normal(kx, (BATCH, INPUT_DIM, SEQ_LEN), jnp.float32)  # [batch, features, time]
    params = init_params(kp, INPUT_DIM, OUTPUT_DIM, NUM_CHANNELS, NUM_LAYERS)
    packed = pack_params(params)

    fwd = jax.jit(lambda xx: tcn_forward(xx, packed))
    out = jax.block_until_ready(fwd(x))

    ref_bf16 = jax.block_until_ready(tcn_reference(x, params, matmul_dtype=jnp.bfloat16))
    ref_f32 = jax.block_until_ready(tcn_reference(x, params))

    assert out.shape == (BATCH, OUTPUT_DIM), out.shape
    assert bool(jnp.all(jnp.isfinite(out)))
    # Logic check: against a reference using the same bf16 conv-matmul precision.
    assert bool(jnp.allclose(out, ref_bf16, atol=2e-3, rtol=2e-3)), (out, ref_bf16)
    # Fidelity check: against the full-f32 PyTorch-semantics reference (bf16 matmul noise).
    assert bool(jnp.allclose(out, ref_f32, atol=5e-2, rtol=5e-2)), (out, ref_f32)
    print("KERNEL_OK")
</pallas_src>

<mosaic_0001>
module attributes {stable_mosaic.version = 11 : i64} {
  func.func @_fused_tcn_kernel(%arg0: memref<64x128xf32, #tpu.memory_space<vmem>>, %arg1: memref<256x128xbf16, #tpu.memory_space<vmem>>, %arg2: memref<1x128xf32, #tpu.memory_space<vmem>>, %arg3: memref<1x128xf32, #tpu.memory_space<vmem>>, %arg4: memref<1x128xf32, #tpu.memory_space<vmem>>, %arg5: memref<256x128xbf16, #tpu.memory_space<vmem>>, %arg6: memref<1x128xf32, #tpu.memory_space<vmem>>, %arg7: memref<1x128xf32, #tpu.memory_space<vmem>>, %arg8: memref<1x128xf32, #tpu.memory_space<vmem>>, %arg9: memref<256x128xbf16, #tpu.memory_space<vmem>>, %arg10: memref<1x128xf32, #tpu.memory_space<vmem>>, %arg11: memref<1x128xf32, #tpu.memory_space<vmem>>, %arg12: memref<1x128xf32, #tpu.memory_space<vmem>>, %arg13: memref<128x128xf32, #tpu.memory_space<vmem>>, %arg14: memref<1x128xf32, #tpu.memory_space<vmem>>, %arg15: memref<2x128xf32, #tpu.memory_space<vmem>>) attributes {dimension_semantics = [], scalar_prefetch = 0 : i64, scratch_operands = 0 : i64, tpu.core_type = #tpu.core_type<tc>} {
    %c0 = arith.constant 0 : index
    %c0_0 = arith.constant 0 : index
    %0 = vector.load %arg0[%c0, %c0_0] : memref<64x128xf32, #tpu.memory_space<vmem>>, vector<64x128xf32>
    %c1_i32 = arith.constant 1 : i32
    %1 = tpu.dynamic_rotate %0 by %c1_i32 dim 0 : vector<64x128xf32>, i32 -> vector<64x128xf32>
    %2 = tpu.concatenate %1, %0 in 1 : vector<64x128xf32>, vector<64x128xf32> -> vector<64x256xf32>
    %3 = arith.truncf %2 : vector<64x256xf32> to vector<64x256xbf16>
    %c0_1 = arith.constant 0 : index
    %c0_2 = arith.constant 0 : index
    %4 = vector.load %arg1[%c0_1, %c0_2] : memref<256x128xbf16, #tpu.memory_space<vmem>>, vector<256x128xbf16>
    %cst = arith.constant dense<0.000000e+00> : vector<64x128xf32>
    %5 = tpu.matmul %3, %4, %cst {dimension_numbers = #tpu.dot_dimension_numbers<[1], [0], [0], [1], [0, 0, 1, 1], [], []>} : vector<64x256xbf16>, vector<256x128xbf16>, vector<64x128xf32> -> vector<64x128xf32>
    %c0_3 = arith.constant 0 : index
    %c0_4 = arith.constant 0 : index
    %6 = vector.load %arg2[%c0_3, %c0_4] : memref<1x128xf32, #tpu.memory_space<vmem>>, vector<1x128xf32>
    %7 = vector.broadcast %6 : vector<1x128xf32> to vector<64x128xf32>
    %8 = arith.addf %5, %7 : vector<64x128xf32>
    %9 = tpu.iota {dimensions = array<i32: 0>} : vector<64x128xi32>
    %c32_i32 = arith.constant 32 : i32
    %c0_i32 = arith.constant 0 : i32
    %10 = arith.cmpi eq, %c32_i32, %c0_i32 : i32
    %c1_i32_5 = arith.constant 1 : i32
    %11 = arith.select %10, %c1_i32_5, %c32_i32 : i32
    %12 = vector.broadcast %11 : i32 to vector<64x128xi32>
    %13 = arith.remsi %9, %12 : vector<64x128xi32>
    %c0_i32_6 = arith.constant 0 : i32
    %14 = vector.broadcast %c0_i32_6 : i32 to vector<64x128xi32>
    %15 = arith.cmpi ne, %13, %14 : vector<64x128xi32>
    %c0_i32_7 = arith.constant 0 : i32
    %16 = vector.broadcast %c0_i32_7 : i32 to vector<64x128xi32>
    %17 = arith.cmpi slt, %13, %16 : vector<64x128xi32>
    %c0_i32_8 = arith.constant 0 : i32
    %18 = arith.cmpi slt, %11, %c0_i32_8 : i32
    %19 = vector.broadcast %18 : i1 to vector<64x128xi1>
    %20 = vector.broadcast %19 : vector<64x128xi1> to vector<64x128xi1>
    %21 = arith.xori %17, %20 : vector<64x128xi1>
    %22 = arith.andi %21, %15 : vector<64x128xi1>
    %23 = vector.broadcast %11 : i32 to vector<64x128xi32>
    %24 = arith.addi %13, %23 : vector<64x128xi32>
    %25 = arith.select %22, %24, %13 : vector<64x128xi1>, vector<64x128xi32>
    %c8_i32 = arith.constant 8 : i32
    %26 = vector.broadcast %c8_i32 : i32 to vector<64x128xi32>
    %27 = arith.cmpi sge, %25, %26 : vector<64x128xi32>
    %c25_i32 = arith.constant 25 : i32
    %28 = vector.broadcast %c25_i32 : i32 to vector<64x128xi32>
    %29 = arith.cmpi slt, %25, %28 : vector<64x128xi32>
    %30 = arith.andi %27, %29 : vector<64x128xi1>
    %31 = arith.extui %30 : vector<64x128xi1> to vector<64x128xi32>
    %32 = arith.sitofp %31 : vector<64x128xi32> to vector<64x128xf32>
    %33 = arith.mulf %8, %32 : vector<64x128xf32>
    %cst_9 = arith.constant dense<0.000000e+00> : vector<128xf32>
    %34 = vector.multi_reduction <add>, %33, %cst_9 [0] : vector<64x128xf32> to vector<128xf32>
    %35 = vector.shape_cast %34 : vector<128xf32> to vector<1x128xf32>
    %cst_10 = arith.constant 0.0294117648 : f32
    %36 = vector.broadcast %cst_10 : f32 to vector<1x128xf32>
    %37 = arith.mulf %35, %36 : vector<1x128xf32>
    %38 = arith.mulf %8, %33 : vector<64x128xf32>
    %cst_11 = arith.constant dense<0.000000e+00> : vector<128xf32>
    %39 = vector.multi_reduction <add>, %38, %cst_11 [0] : vector<64x128xf32> to vector<128xf32>
    %40 = vector.shape_cast %39 : vector<128xf32> to vector<1x128xf32>
    %cst_12 = arith.constant 0.0294117648 : f32
    %41 = vector.broadcast %cst_12 : f32 to vector<1x128xf32>
    %42 = arith.mulf %40, %41 : vector<1x128xf32>
    %43 = arith.mulf %37, %37 : vector<1x128xf32>
    %44 = arith.subf %42, %43 : vector<1x128xf32>
    %cst_13 = arith.constant 0.000000e+00 : f32
    %45 = vector.broadcast %cst_13 : f32 to vector<1x128xf32>
    %46 = arith.maximumf %44, %45 : vector<1x128xf32>
    %47 = vector.broadcast %37 : vector<1x128xf32> to vector<64x128xf32>
    %48 = arith.subf %8, %47 : vector<64x128xf32>
    %cst_14 = arith.constant 9.99999974E-6 : f32
    %49 = vector.broadcast %cst_14 : f32 to vector<1x128xf32>
    %50 = arith.addf %46, %49 : vector<1x128xf32>
    %51 = math.rsqrt %50 : vector<1x128xf32>
    %52 = vector.broadcast %51 : vector<1x128xf32> to vector<64x128xf32>
    %53 = arith.mulf %48, %52 : vector<64x128xf32>
    %c0_15 = arith.constant 0 : index
    %c0_16 = arith.constant 0 : index
    %54 = vector.load %arg3[%c0_15, %c0_16] : memref<1x128xf32, #tpu.memory_space<vmem>>, vector<1x128xf32>
    %55 = vector.broadcast %54 : vector<1x128xf32> to vector<64x128xf32>
    %56 = arith.mulf %53, %55 : vector<64x128xf32>
    %c0_17 = arith.constant 0 : index
    %c0_18 = arith.constant 0 : index
    %57 = vector.load %arg4[%c0_17, %c0_18] : memref<1x128xf32, #tpu.memory_space<vmem>>, vector<1x128xf32>
    %58 = vector.broadcast %57 : vector<1x128xf32> to vector<64x128xf32>
    %59 = arith.addf %56, %58 : vector<64x128xf32>
    %cst_19 = arith.constant 5.000000e-01 : f32
    %60 = vector.broadcast %cst_19 : f32 to vector<64x128xf32>
    %61 = arith.mulf %60, %59 : vector<64x128xf32>
    %cst_20 = arith.constant 0.707106769 : f32
    %62 = vector.broadcast %cst_20 : f32 to vector<64x128xf32>
    %63 = arith.mulf %59, %62 : vector<64x128xf32>
    %64 = math.absf %63 : vector<64x128xf32>
    %cst_21 = arith.constant 0.327591091 : f32
    %65 = vector.broadcast %cst_21 : f32 to vector<64x128xf32>
    %66 = arith.mulf %65, %64 : vector<64x128xf32>
    %cst_22 = arith.constant 1.000000e+00 : f32
    %67 = vector.broadcast %cst_22 : f32 to vector<64x128xf32>
    %68 = arith.addf %67, %66 : vector<64x128xf32>
    %cst_23 = arith.constant 1.000000e+00 : f32
    %69 = vector.broadcast %cst_23 : f32 to vector<64x128xf32>
    %70 = arith.divf %69, %68 : vector<64x128xf32>
    %cst_24 = arith.constant 1.06140542 : f32
    %71 = vector.broadcast %cst_24 : f32 to vector<64x128xf32>
    %72 = arith.mulf %71, %70 : vector<64x128xf32>
    %cst_25 = arith.constant -1.45315206 : f32
    %73 = vector.broadcast %cst_25 : f32 to vector<64x128xf32>
    %74 = arith.addf %72, %73 : vector<64x128xf32>
    %75 = arith.mulf %74, %70 : vector<64x128xf32>
    %cst_26 = arith.constant 1.42141378 : f32
    %76 = vector.broadcast %cst_26 : f32 to vector<64x128xf32>
    %77 = arith.addf %75, %76 : vector<64x128xf32>
    %78 = arith.mulf %77, %70 : vector<64x128xf32>
    %cst_27 = arith.constant -0.284496725 : f32
    %79 = vector.broadcast %cst_27 : f32 to vector<64x128xf32>
    %80 = arith.addf %78, %79 : vector<64x128xf32>
    %81 = arith.mulf %80, %70 : vector<64x128xf32>
    %cst_28 = arith.constant 0.254829586 : f32
    %82 = vector.broadcast %cst_28 : f32 to vector<64x128xf32>
    %83 = arith.addf %81, %82 : vector<64x128xf32>
    %84 = arith.mulf %83, %70 : vector<64x128xf32>
    %cst_29 = arith.constant 0.000000e+00 : f32
    %85 = vector.broadcast %cst_29 : f32 to vector<64x128xf32>
    %86 = arith.subf %85, %64 : vector<64x128xf32>
    %87 = arith.mulf %86, %64 : vector<64x128xf32>
    %88 = math.exp %87 : vector<64x128xf32>
    %89 = arith.mulf %84, %88 : vector<64x128xf32>
    %cst_30 = arith.constant 1.000000e+00 : f32
    %90 = vector.broadcast %cst_30 : f32 to vector<64x128xf32>
    %91 = arith.subf %90, %89 : vector<64x128xf32>
    %cst_31 = arith.constant 0.000000e+00 : f32
    %92 = vector.broadcast %cst_31 : f32 to vector<64x128xf32>
    %93 = arith.cmpf oge, %63, %92 : vector<64x128xf32>
    %cst_32 = arith.constant 0.000000e+00 : f32
    %94 = vector.broadcast %cst_32 : f32 to vector<64x128xf32>
    %95 = arith.subf %94, %91 : vector<64x128xf32>
    %96 = arith.select %93, %91, %95 : vector<64x128xi1>, vector<64x128xf32>
    %cst_33 = arith.constant 1.000000e+00 : f32
    %97 = vector.broadcast %cst_33 : f32 to vector<64x128xf32>
    %98 = arith.addf %97, %96 : vector<64x128xf32>
    %99 = arith.mulf %61, %98 : vector<64x128xf32>
    %100 = arith.mulf %99, %32 : vector<64x128xf32>
    %c2_i32 = arith.constant 2 : i32
    %101 = tpu.dynamic_rotate %100 by %c2_i32 dim 0 : vector<64x128xf32>, i32 -> vector<64x128xf32>
    %102 = tpu.concatenate %101, %100 in 1 : vector<64x128xf32>, vector<64x128xf32> -> vector<64x256xf32>
    %103 = arith.truncf %102 : vector<64x256xf32> to vector<64x256xbf16>
    %c0_34 = arith.constant 0 : index
    %c0_35 = arith.constant 0 : index
    %104 = vector.load %arg5[%c0_34, %c0_35] : memref<256x128xbf16, #tpu.memory_space<vmem>>, vector<256x128xbf16>
    %cst_36 = arith.constant dense<0.000000e+00> : vector<64x128xf32>
    %105 = tpu.matmul %103, %104, %cst_36 {dimension_numbers = #tpu.dot_dimension_numbers<[1], [0], [0], [1], [0, 0, 1, 1], [], []>} : vector<64x256xbf16>, vector<256x128xbf16>, vector<64x128xf32> -> vector<64x128xf32>
    %c0_37 = arith.constant 0 : index
    %c0_38 = arith.constant 0 : index
    %106 = vector.load %arg6[%c0_37, %c0_38] : memref<1x128xf32, #tpu.memory_space<vmem>>, vector<1x128xf32>
    %107 = vector.broadcast %106 : vector<1x128xf32> to vector<64x128xf32>
    %108 = arith.addf %105, %107 : vector<64x128xf32>
    %109 = tpu.iota {dimensions = array<i32: 0>} : vector<64x128xi32>
    %c32_i32_39 = arith.constant 32 : i32
    %c0_i32_40 = arith.constant 0 : i32
    %110 = arith.cmpi eq, %c32_i32_39, %c0_i32_40 : i32
    %c1_i32_41 = arith.constant 1 : i32
    %111 = arith.select %110, %c1_i32_41, %c32_i32_39 : i32
    %112 = vector.broadcast %111 : i32 to vector<64x128xi32>
    %113 = arith.remsi %109, %112 : vector<64x128xi32>
    %c0_i32_42 = arith.constant 0 : i32
    %114 = vector.broadcast %c0_i32_42 : i32 to vector<64x128xi32>
    %115 = arith.cmpi ne, %113, %114 : vector<64x128xi32>
    %c0_i32_43 = arith.constant 0 : i32
    %116 = vector.broadcast %c0_i32_43 : i32 to vector<64x128xi32>
    %117 = arith.cmpi slt, %113, %116 : vector<64x128xi32>
    %c0_i32_44 = arith.constant 0 : i32
    %118 = arith.cmpi slt, %111, %c0_i32_44 : i32
    %119 = vector.broadcast %118 : i1 to vector<64x128xi1>
    %120 = vector.broadcast %119 : vector<64x128xi1> to vector<64x128xi1>
    %121 = arith.xori %117, %120 : vector<64x128xi1>
    %122 = arith.andi %121, %115 : vector<64x128xi1>
    %123 = vector.broadcast %111 : i32 to vector<64x128xi32>
    %124 = arith.addi %113, %123 : vector<64x128xi32>
    %125 = arith.select %122, %124, %113 : vector<64x128xi1>, vector<64x128xi32>
    %c8_i32_45 = arith.constant 8 : i32
    %126 = vector.broadcast %c8_i32_45 : i32 to vector<64x128xi32>
    %127 = arith.cmpi sge, %125, %126 : vector<64x128xi32>
    %c27_i32 = arith.constant 27 : i32
    %128 = vector.broadcast %c27_i32 : i32 to vector<64x128xi32>
    %129 = arith.cmpi slt, %125, %128 : vector<64x128xi32>
    %130 = arith.andi %127, %129 : vector<64x128xi1>
    %131 = arith.extui %130 : vector<64x128xi1> to vector<64x128xi32>
    %132 = arith.sitofp %131 : vector<64x128xi32> to vector<64x128xf32>
    %133 = arith.mulf %108, %132 : vector<64x128xf32>
    %cst_46 = arith.constant dense<0.000000e+00> : vector<128xf32>
    %134 = vector.multi_reduction <add>, %133, %cst_46 [0] : vector<64x128xf32> to vector<128xf32>
    %135 = vector.shape_cast %134 : vector<128xf32> to vector<1x128xf32>
    %cst_47 = arith.constant 0.0263157897 : f32
    %136 = vector.broadcast %cst_47 : f32 to vector<1x128xf32>
    %137 = arith.mulf %135, %136 : vector<1x128xf32>
    %138 = arith.mulf %108, %133 : vector<64x128xf32>
    %cst_48 = arith.constant dense<0.000000e+00> : vector<128xf32>
    %139 = vector.multi_reduction <add>, %138, %cst_48 [0] : vector<64x128xf32> to vector<128xf32>
    %140 = vector.shape_cast %139 : vector<128xf32> to vector<1x128xf32>
    %cst_49 = arith.constant 0.0263157897 : f32
    %141 = vector.broadcast %cst_49 : f32 to vector<1x128xf32>
    %142 = arith.mulf %140, %141 : vector<1x128xf32>
    %143 = arith.mulf %137, %137 : vector<1x128xf32>
    %144 = arith.subf %142, %143 : vector<1x128xf32>
    %cst_50 = arith.constant 0.000000e+00 : f32
    %145 = vector.broadcast %cst_50 : f32 to vector<1x128xf32>
    %146 = arith.maximumf %144, %145 : vector<1x128xf32>
    %147 = vector.broadcast %137 : vector<1x128xf32> to vector<64x128xf32>
    %148 = arith.subf %108, %147 : vector<64x128xf32>
    %cst_51 = arith.constant 9.99999974E-6 : f32
    %149 = vector.broadcast %cst_51 : f32 to vector<1x128xf32>
    %150 = arith.addf %146, %149 : vector<1x128xf32>
    %151 = math.rsqrt %150 : vector<1x128xf32>
    %152 = vector.broadcast %151 : vector<1x128xf32> to vector<64x128xf32>
    %153 = arith.mulf %148, %152 : vector<64x128xf32>
    %c0_52 = arith.constant 0 : index
    %c0_53 = arith.constant 0 : index
    %154 = vector.load %arg7[%c0_52, %c0_53] : memref<1x128xf32, #tpu.memory_space<vmem>>, vector<1x128xf32>
    %155 = vector.broadcast %154 : vector<1x128xf32> to vector<64x128xf32>
    %156 = arith.mulf %153, %155 : vector<64x128xf32>
    %c0_54 = arith.constant 0 : index
    %c0_55 = arith.constant 0 : index
    %157 = vector.load %arg8[%c0_54, %c0_55] : memref<1x128xf32, #tpu.memory_space<vmem>>, vector<1x128xf32>
    %158 = vector.broadcast %157 : vector<1x128xf32> to vector<64x128xf32>
    %159 = arith.addf %156, %158 : vector<64x128xf32>
    %cst_56 = arith.constant 5.000000e-01 : f32
    %160 = vector.broadcast %cst_56 : f32 to vector<64x128xf32>
    %161 = arith.mulf %160, %159 : vector<64x128xf32>
    %cst_57 = arith.constant 0.707106769 : f32
    %162 = vector.broadcast %cst_57 : f32 to vector<64x128xf32>
    %163 = arith.mulf %159, %162 : vector<64x128xf32>
    %164 = math.absf %163 : vector<64x128xf32>
    %cst_58 = arith.constant 0.327591091 : f32
    %165 = vector.broadcast %cst_58 : f32 to vector<64x128xf32>
    %166 = arith.mulf %165, %164 : vector<64x128xf32>
    %cst_59 = arith.constant 1.000000e+00 : f32
    %167 = vector.broadcast %cst_59 : f32 to vector<64x128xf32>
    %168 = arith.addf %167, %166 : vector<64x128xf32>
    %cst_60 = arith.constant 1.000000e+00 : f32
    %169 = vector.broadcast %cst_60 : f32 to vector<64x128xf32>
    %170 = arith.divf %169, %168 : vector<64x128xf32>
    %cst_61 = arith.constant 1.06140542 : f32
    %171 = vector.broadcast %cst_61 : f32 to vector<64x128xf32>
    %172 = arith.mulf %171, %170 : vector<64x128xf32>
    %cst_62 = arith.constant -1.45315206 : f32
    %173 = vector.broadcast %cst_62 : f32 to vector<64x128xf32>
    %174 = arith.addf %172, %173 : vector<64x128xf32>
    %175 = arith.mulf %174, %170 : vector<64x128xf32>
    %cst_63 = arith.constant 1.42141378 : f32
    %176 = vector.broadcast %cst_63 : f32 to vector<64x128xf32>
    %177 = arith.addf %175, %176 : vector<64x128xf32>
    %178 = arith.mulf %177, %170 : vector<64x128xf32>
    %cst_64 = arith.constant -0.284496725 : f32
    %179 = vector.broadcast %cst_64 : f32 to vector<64x128xf32>
    %180 = arith.addf %178, %179 : vector<64x128xf32>
    %181 = arith.mulf %180, %170 : vector<64x128xf32>
    %cst_65 = arith.constant 0.254829586 : f32
    %182 = vector.broadcast %cst_65 : f32 to vector<64x128xf32>
    %183 = arith.addf %181, %182 : vector<64x128xf32>
    %184 = arith.mulf %183, %170 : vector<64x128xf32>
    %cst_66 = arith.constant 0.000000e+00 : f32
    %185 = vector.broadcast %cst_66 : f32 to vector<64x128xf32>
    %186 = arith.subf %185, %164 : vector<64x128xf32>
    %187 = arith.mulf %186, %164 : vector<64x128xf32>
    %188 = math.exp %187 : vector<64x128xf32>
    %189 = arith.mulf %184, %188 : vector<64x128xf32>
    %cst_67 = arith.constant 1.000000e+00 : f32
    %190 = vector.broadcast %cst_67 : f32 to vector<64x128xf32>
    %191 = arith.subf %190, %189 : vector<64x128xf32>
    %cst_68 = arith.constant 0.000000e+00 : f32
    %192 = vector.broadcast %cst_68 : f32 to vector<64x128xf32>
    %193 = arith.cmpf oge, %163, %192 : vector<64x128xf32>
    %cst_69 = arith.constant 0.000000e+00 : f32
    %194 = vector.broadcast %cst_69 : f32 to vector<64x128xf32>
    %195 = arith.subf %194, %191 : vector<64x128xf32>
    %196 = arith.select %193, %191, %195 : vector<64x128xi1>, vector<64x128xf32>
    %cst_70 = arith.constant 1.000000e+00 : f32
    %197 = vector.broadcast %cst_70 : f32 to vector<64x128xf32>
    %198 = arith.addf %197, %196 : vector<64x128xf32>
    %199 = arith.mulf %161, %198 : vector<64x128xf32>
    %200 = arith.mulf %199, %132 : vector<64x128xf32>
    %c4_i32 = arith.constant 4 : i32
    %201 = tpu.dynamic_rotate %200 by %c4_i32 dim 0 : vector<64x128xf32>, i32 -> vector<64x128xf32>
    %202 = tpu.concatenate %201, %200 in 1 : vector<64x128xf32>, vector<64x128xf32> -> vector<64x256xf32>
    %203 = arith.truncf %202 : vector<64x256xf32> to vector<64x256xbf16>
    %c0_71 = arith.constant 0 : index
    %c0_72 = arith.constant 0 : index
    %204 = vector.load %arg9[%c0_71, %c0_72] : memref<256x128xbf16, #tpu.memory_space<vmem>>, vector<256x128xbf16>
    %cst_73 = arith.constant dense<0.000000e+00> : vector<64x128xf32>
    %205 = tpu.matmul %203, %204, %cst_73 {dimension_numbers = #tpu.dot_dimension_numbers<[1], [0], [0], [1], [0, 0, 1, 1], [], []>} : vector<64x256xbf16>, vector<256x128xbf16>, vector<64x128xf32> -> vector<64x128xf32>
    %c0_74 = arith.constant 0 : index
    %c0_75 = arith.constant 0 : index
    %206 = vector.load %arg10[%c0_74, %c0_75] : memref<1x128xf32, #tpu.memory_space<vmem>>, vector<1x128xf32>
    %207 = vector.broadcast %206 : vector<1x128xf32> to vector<64x128xf32>
    %208 = arith.addf %205, %207 : vector<64x128xf32>
    %209 = tpu.iota {dimensions = array<i32: 0>} : vector<64x128xi32>
    %c32_i32_76 = arith.constant 32 : i32
    %c0_i32_77 = arith.constant 0 : i32
    %210 = arith.cmpi eq, %c32_i32_76, %c0_i32_77 : i32
    %c1_i32_78 = arith.constant 1 : i32
    %211 = arith.select %210, %c1_i32_78, %c32_i32_76 : i32
    %212 = vector.broadcast %211 : i32 to vector<64x128xi32>
    %213 = arith.remsi %209, %212 : vector<64x128xi32>
    %c0_i32_79 = arith.constant 0 : i32
    %214 = vector.broadcast %c0_i32_79 : i32 to vector<64x128xi32>
    %215 = arith.cmpi ne, %213, %214 : vector<64x128xi32>
    %c0_i32_80 = arith.constant 0 : i32
    %216 = vector.broadcast %c0_i32_80 : i32 to vector<64x128xi32>
    %217 = arith.cmpi slt, %213, %216 : vector<64x128xi32>
    %c0_i32_81 = arith.constant 0 : i32
    %218 = arith.cmpi slt, %211, %c0_i32_81 : i32
    %219 = vector.broadcast %218 : i1 to vector<64x128xi1>
    %220 = vector.broadcast %219 : vector<64x128xi1> to vector<64x128xi1>
    %221 = arith.xori %217, %220 : vector<64x128xi1>
    %222 = arith.andi %221, %215 : vector<64x128xi1>
    %223 = vector.broadcast %211 : i32 to vector<64x128xi32>
    %224 = arith.addi %213, %223 : vector<64x128xi32>
    %225 = arith.select %222, %224, %213 : vector<64x128xi1>, vector<64x128xi32>
    %c8_i32_82 = arith.constant 8 : i32
    %226 = vector.broadcast %c8_i32_82 : i32 to vector<64x128xi32>
    %227 = arith.cmpi sge, %225, %226 : vector<64x128xi32>
    %c31_i32 = arith.constant 31 : i32
    %228 = vector.broadcast %c31_i32 : i32 to vector<64x128xi32>
    %229 = arith.cmpi slt, %225, %228 : vector<64x128xi32>
    %230 = arith.andi %227, %229 : vector<64x128xi1>
    %231 = arith.extui %230 : vector<64x128xi1> to vector<64x128xi32>
    %232 = arith.sitofp %231 : vector<64x128xi32> to vector<64x128xf32>
    %233 = arith.mulf %208, %232 : vector<64x128xf32>
    %cst_83 = arith.constant dense<0.000000e+00> : vector<128xf32>
    %234 = vector.multi_reduction <add>, %233, %cst_83 [0] : vector<64x128xf32> to vector<128xf32>
    %235 = vector.shape_cast %234 : vector<128xf32> to vector<1x128xf32>
    %cst_84 = arith.constant 0.0217391308 : f32
    %236 = vector.broadcast %cst_84 : f32 to vector<1x128xf32>
    %237 = arith.mulf %235, %236 : vector<1x128xf32>
    %238 = arith.mulf %208, %233 : vector<64x128xf32>
    %cst_85 = arith.constant dense<0.000000e+00> : vector<128xf32>
    %239 = vector.multi_reduction <add>, %238, %cst_85 [0] : vector<64x128xf32> to vector<128xf32>
    %240 = vector.shape_cast %239 : vector<128xf32> to vector<1x128xf32>
    %cst_86 = arith.constant 0.0217391308 : f32
    %241 = vector.broadcast %cst_86 : f32 to vector<1x128xf32>
    %242 = arith.mulf %240, %241 : vector<1x128xf32>
    %243 = arith.mulf %237, %237 : vector<1x128xf32>
    %244 = arith.subf %242, %243 : vector<1x128xf32>
    %cst_87 = arith.constant 0.000000e+00 : f32
    %245 = vector.broadcast %cst_87 : f32 to vector<1x128xf32>
    %246 = arith.maximumf %244, %245 : vector<1x128xf32>
    %247 = vector.broadcast %237 : vector<1x128xf32> to vector<64x128xf32>
    %248 = arith.subf %208, %247 : vector<64x128xf32>
    %cst_88 = arith.constant 9.99999974E-6 : f32
    %249 = vector.broadcast %cst_88 : f32 to vector<1x128xf32>
    %250 = arith.addf %246, %249 : vector<1x128xf32>
    %251 = math.rsqrt %250 : vector<1x128xf32>
    %252 = vector.broadcast %251 : vector<1x128xf32> to vector<64x128xf32>
    %253 = arith.mulf %248, %252 : vector<64x128xf32>
    %c0_89 = arith.constant 0 : index
    %c0_90 = arith.constant 0 : index
    %254 = vector.load %arg11[%c0_89, %c0_90] : memref<1x128xf32, #tpu.memory_space<vmem>>, vector<1x128xf32>
    %255 = vector.broadcast %254 : vector<1x128xf32> to vector<64x128xf32>
    %256 = arith.mulf %253, %255 : vector<64x128xf32>
    %c0_91 = arith.constant 0 : index
    %c0_92 = arith.constant 0 : index
    %257 = vector.load %arg12[%c0_91, %c0_92] : memref<1x128xf32, #tpu.memory_space<vmem>>, vector<1x128xf32>
    %258 = vector.broadcast %257 : vector<1x128xf32> to vector<64x128xf32>
    %259 = arith.addf %256, %258 : vector<64x128xf32>
    %cst_93 = arith.constant 5.000000e-01 : f32
    %260 = vector.broadcast %cst_93 : f32 to vector<64x128xf32>
    %261 = arith.mulf %260, %259 : vector<64x128xf32>
    %cst_94 = arith.constant 0.707106769 : f32
    %262 = vector.broadcast %cst_94 : f32 to vector<64x128xf32>
    %263 = arith.mulf %259, %262 : vector<64x128xf32>
    %264 = math.absf %263 : vector<64x128xf32>
    %cst_95 = arith.constant 0.327591091 : f32
    %265 = vector.broadcast %cst_95 : f32 to vector<64x128xf32>
    %266 = arith.mulf %265, %264 : vector<64x128xf32>
    %cst_96 = arith.constant 1.000000e+00 : f32
    %267 = vector.broadcast %cst_96 : f32 to vector<64x128xf32>
    %268 = arith.addf %267, %266 : vector<64x128xf32>
    %cst_97 = arith.constant 1.000000e+00 : f32
    %269 = vector.broadcast %cst_97 : f32 to vector<64x128xf32>
    %270 = arith.divf %269, %268 : vector<64x128xf32>
    %cst_98 = arith.constant 1.06140542 : f32
    %271 = vector.broadcast %cst_98 : f32 to vector<64x128xf32>
    %272 = arith.mulf %271, %270 : vector<64x128xf32>
    %cst_99 = arith.constant -1.45315206 : f32
    %273 = vector.broadcast %cst_99 : f32 to vector<64x128xf32>
    %274 = arith.addf %272, %273 : vector<64x128xf32>
    %275 = arith.mulf %274, %270 : vector<64x128xf32>
    %cst_100 = arith.constant 1.42141378 : f32
    %276 = vector.broadcast %cst_100 : f32 to vector<64x128xf32>
    %277 = arith.addf %275, %276 : vector<64x128xf32>
    %278 = arith.mulf %277, %270 : vector<64x128xf32>
    %cst_101 = arith.constant -0.284496725 : f32
    %279 = vector.broadcast %cst_101 : f32 to vector<64x128xf32>
    %280 = arith.addf %278, %279 : vector<64x128xf32>
    %281 = arith.mulf %280, %270 : vector<64x128xf32>
    %cst_102 = arith.constant 0.254829586 : f32
    %282 = vector.broadcast %cst_102 : f32 to vector<64x128xf32>
    %283 = arith.addf %281, %282 : vector<64x128xf32>
    %284 = arith.mulf %283, %270 : vector<64x128xf32>
    %cst_103 = arith.constant 0.000000e+00 : f32
    %285 = vector.broadcast %cst_103 : f32 to vector<64x128xf32>
    %286 = arith.subf %285, %264 : vector<64x128xf32>
    %287 = arith.mulf %286, %264 : vector<64x128xf32>
    %288 = math.exp %287 : vector<64x128xf32>
    %289 = arith.mulf %284, %288 : vector<64x128xf32>
    %cst_104 = arith.constant 1.000000e+00 : f32
    %290 = vector.broadcast %cst_104 : f32 to vector<64x128xf32>
    %291 = arith.subf %290, %289 : vector<64x128xf32>
    %cst_105 = arith.constant 0.000000e+00 : f32
    %292 = vector.broadcast %cst_105 : f32 to vector<64x128xf32>
    %293 = arith.cmpf oge, %263, %292 : vector<64x128xf32>
    %cst_106 = arith.constant 0.000000e+00 : f32
    %294 = vector.broadcast %cst_106 : f32 to vector<64x128xf32>
    %295 = arith.subf %294, %291 : vector<64x128xf32>
    %296 = arith.select %293, %291, %295 : vector<64x128xi1>, vector<64x128xf32>
    %cst_107 = arith.constant 1.000000e+00 : f32
    %297 = vector.broadcast %cst_107 : f32 to vector<64x128xf32>
    %298 = arith.addf %297, %296 : vector<64x128xf32>
    %299 = arith.mulf %261, %298 : vector<64x128xf32>
    %300 = arith.mulf %299, %232 : vector<64x128xf32>
    %301 = vector.shape_cast %300 : vector<64x128xf32> to vector<2x32x128xf32>
    %cst_108 = arith.constant dense<0.000000e+00> : vector<2x128xf32>
    %302 = vector.multi_reduction <add>, %301, %cst_108 [1] : vector<2x32x128xf32> to vector<2x128xf32>
    %cst_109 = arith.constant 0.0434782617 : f32
    %303 = vector.broadcast %cst_109 : f32 to vector<2x128xf32>
    %304 = arith.mulf %302, %303 : vector<2x128xf32>
    %c0_110 = arith.constant 0 : index
    %c0_111 = arith.constant 0 : index
    %305 = vector.load %arg13[%c0_110, %c0_111] : memref<128x128xf32, #tpu.memory_space<vmem>>, vector<128x128xf32>
    %cst_112 = arith.constant dense<0.000000e+00> : vector<2x128xf32>
    %306 = tpu.matmul %304, %305, %cst_112 {dimension_numbers = #tpu.dot_dimension_numbers<[1], [0], [0], [1], [0, 0, 1, 1], [], []>} : vector<2x128xf32>, vector<128x128xf32>, vector<2x128xf32> -> vector<2x128xf32>
    %c0_113 = arith.constant 0 : index
    %c0_114 = arith.constant 0 : index
    %307 = vector.load %arg14[%c0_113, %c0_114] : memref<1x128xf32, #tpu.memory_space<vmem>>, vector<1x128xf32>
    %308 = vector.broadcast %307 : vector<1x128xf32> to vector<2x128xf32>
    %309 = arith.addf %306, %308 : vector<2x128xf32>
    %c0_115 = arith.constant 0 : index
    %c0_116 = arith.constant 0 : index
    %310 = vector.load %arg15[%c0_115, %c0_116] : memref<2x128xf32, #tpu.memory_space<vmem>>, vector<2x128xf32>
    tpu.vector_store %arg15[%c0_115, %c0_116], %309 {strides = array<i32>} : memref<2x128xf32, #tpu.memory_space<vmem>>, vector<2x128xf32>,
    return
  }
}

</mosaic_0001>

<bundles_post_ra>
// kernel: _lambda_.1
= control target key start
LH: loop header
LB: loop body
LE: loop exit
PB: predicated region body
PF: predicated region fallthrough
CT: control target
= control target key end

     0   :  { %20 = vsyncpa [#allocation3], 0  ;;  %s3442_s0 = inlined_call_operand.vmem [shape: f32[64,128], index: 0, kind: input, shape index: {}]   ;;  %s3443_s1 = inlined_call_operand.vmem [shape: bf16[256,128], index: 1, kind: input, shape index: {}]   ;;  %s3444_s2 = inlined_call_operand.vmem [shape: f32[1,128], index: 2, kind: input, shape index: {}]   ;;  %s3445_s3 = inlined_call_operand.vmem [shape: f32[1,128], index: 3, kind: input, shape index: {}, may-alias: {3,7,11}]   ;;  %s3446_s4 = inlined_call_operand.vmem [shape: f32[1,128], index: 4, kind: input, shape index: {}, may-alias: {4,8,12}]   ;;  %s3447_s5 = inlined_call_operand.hbm [shape: bf16[256,128], index: 5, kind: input, shape index: {}]   ;;  %s3448_s6 = inlined_call_operand.vmem [shape: f32[1,128], index: 6, kind: input, shape index: {}]   ;;  %s3449_s7 = inlined_call_operand.vmem [shape: f32[1,128], index: 7, kind: input, shape index: {}, may-alias: {3,7,11}]   ;;  %s3450_s8 = inlined_call_operand.vmem [shape: f32[1,128], index: 8, kind: input, shape index: {}, may-alias: {4,8,12}]   ;;  %s3451_s9 = inlined_call_operand.hbm [shape: bf16[256,128], index: 9, kind: input, shape index: {}]   ;;  %s3452_s10 = inlined_call_operand.vmem [shape: f32[1,128], index: 10, kind: input, shape index: {}]   ;;  %s3453_s11 = inlined_call_operand.vmem [shape: f32[1,128], index: 11, kind: input, shape index: {}, may-alias: {3,7,11}]   ;;  %s3454_s12 = inlined_call_operand.vmem [shape: f32[1,128], index: 12, kind: input, shape index: {}, may-alias: {4,8,12}]   ;;  %s3455_s13 = inlined_call_operand.hbm [shape: f32[128,128], index: 13, kind: input, shape index: {}]   ;;  %s3456_s14 = inlined_call_operand.vmem [shape: f32[1,128], index: 14, kind: input, shape index: {}]   ;;  %s3457_s15 = inlined_call_operand.hbm [shape: f32[2,128], index: 15, kind: output, shape index: {}]  }
   0x1   :  { %21 = vsyncpa [#allocation6], 0 }
   0x2   :  { %22 = vsyncpa [#allocation4], 0  ;;  %s2592_s18 = smov [#allocation5]   ;;  %s2593_s20 = smov [#allocation2]  }
   0x3   :  { %s56_s19 = sshll.u32 %s2592_s18, 4  ;;  %s38_s21 = sshll.u32 %s2593_s20, 4  ;;  %s57_s19 = int_to_ptr.vmem [resolvable:$true] %s56_s19  ;;  %s2683_s21 = int_to_ptr.vmem [resolvable:$true] %s38_s21 }
   0x4   :  { %s2498_s24 = scalar_lea.hbm %s3451_s9, 2048 }
   0x5   :  { %p2499_p0 = scmp.ne.s32.totalorder %s3451_s9, %s2498_s24  ;;  %p2502_p1 = scmp.lt.u32.totalorder %s2498_s24, %s3451_s9 }
   0x7   :  { %p2504_p2 = pnand %p2502_p1, %p2499_p0 }
   0x9   :  { %2507 = shalt.err (!%p2504_p2)
}
   0xa   :  { %s2508_s29 = scalar_lea.vmem %s57_s19, 2048  ;;  %p2513_p4 = scmp.lt.s32.totalorder %s57_s19, %s57_s19 }
   0xb   :  { %p2509_p3 = scmp.ne.s32.totalorder %s57_s19, %s2508_s29  ;;  %p2514_p5 = scmp.lt.s32.totalorder %s2508_s29, %s2508_s29 }
   0xd   :  { %p2515_p6 = por %p2514_p5, %p2513_p4 }
   0xf   :  { %p2516_p7 = pnand %p2515_p6, %p2509_p3 }
  0x11   :  { %2519 = shalt.err (!%p2516_p7)
}
  0x12   :  { %s2594_s30 = smov 64   ;;  %s2595_s16 = smov 4  }
  0x13   :  { %62 = dma.hbm_to_vmem [thread:$0]  %s3451_s9, 2048, %s57_s19, [#allocation6], %s2594_s30, %s2594_s30, %s2595_s16  }
  0x14   :  { %s2520_s23 = scalar_lea.hbm %s3447_s5, 2048 }
  0x15   :  { %p2521_p8 = scmp.ne.s32.totalorder %s3447_s5, %s2520_s23  ;;  %p2524_p9 = scmp.lt.u32.totalorder %s2520_s23, %s3447_s5 }
  0x17   :  { %p2526_p10 = pnand %p2524_p9, %p2521_p8 }
  0x19   :  { %2529 = shalt.err (!%p2526_p10)
}
  0x1a   :  { %s2530_s28 = scalar_lea.vmem %s2683_s21, 2048  ;;  %p2535_p12 = scmp.lt.s32.totalorder %s2683_s21, %s2683_s21 }
  0x1b   :  { %p2531_p11 = scmp.ne.s32.totalorder %s2683_s21, %s2530_s28  ;;  %p2536_p13 = scmp.lt.s32.totalorder %s2530_s28, %s2530_s28 }
  0x1d   :  { %p2537_p0 = por %p2536_p13, %p2535_p12 }
  0x1f   :  { %p2538_p1 = pnand %p2537_p0, %p2531_p11 }
  0x21   :  { %2541 = shalt.err (!%p2538_p1)
}
  0x22   :  { %44 = dma.hbm_to_vmem [thread:$0]  %s3447_s5, 2048, %s2683_s21, [#allocation3], %s2594_s30, %s2594_s30, %s2595_s16  }
  0x23   :  { %s2596_s29 = smov [#allocation7]   ;;  %s2542_s22 = scalar_lea.hbm %s3455_s13, 2048 }
  0x24   :  { %s74_s17 = sshll.u32 %s2596_s29, 4  ;;  %p2543_p2 = scmp.ne.s32.totalorder %s3455_s13, %s2542_s22  ;;  %s75_s17 = int_to_ptr.vmem [resolvable:$true] %s74_s17 }
  0x25   :  { %p2546_p3 = scmp.lt.u32.totalorder %s2542_s22, %s3455_s13 }
  0x27   :  { %p2548_p4 = pnand %p2546_p3, %p2543_p2 }
  0x29   :  { %2551 = shalt.err (!%p2548_p4)
}
  0x2a   :  { %s2552_s27 = scalar_lea.vmem %s75_s17, 2048  ;;  %p2557_p6 = scmp.lt.s32.totalorder %s75_s17, %s75_s17 }
  0x2b   :  { %p2553_p5 = scmp.ne.s32.totalorder %s75_s17, %s2552_s27  ;;  %p2558_p7 = scmp.lt.s32.totalorder %s2552_s27, %s2552_s27 }
  0x2d   :  { %p2559_p8 = por %p2558_p7, %p2557_p6 }
  0x2f   :  { %p2560_p9 = pnand %p2559_p8, %p2553_p5 }
  0x31   :  { %2563 = shalt.err (!%p2560_p9)
}
  0x32   :  { %s2597_s5 = smov 128   ;;  %s2598_s21 = smov 8  }
  0x33   :  { %80 = dma.hbm_to_vmem [thread:$0]  %s3455_s13, 2048, %s75_s17, [#allocation6], %s2597_s5, %s2597_s5, %s2598_s21  }
  0x34   :  { %2586 = dma.done.wait [#allocation3], 2048  }
  0x35   :  { %2587 = vsyncadd [#allocation3], 4294965248 }
  0x36   :  { %2588 = dma.done.wait [#allocation6], 4096  }
  0x37   :  { %2589 = vsyncadd [#allocation6], 4294963200  ;;  %v2348_v0 = vld [vmem:[%s3443_s1 + $0x40] sm:$0xff]   ;;  %v2350_v2 = vld [vmem:[%s3443_s1 + $0x48] sm:$0xff]   ;;  %v109_v7 = vlaneseq  ;;  %s2602_s29 = smov [#allocation8]  }
  0x38   :  { %v2349_v1 = vld [vmem:[%s3443_s1] sm:$0xff]   ;;  %2141 = vmatprep.subr.bf16.mxu0 %v2348_v0  ;;  %v2351_v3 = vld [vmem:[%s3443_s1 + $0x8] sm:$0xff]   ;;  %v2352_v4 = vld [vmem:[%s3443_s1 + $0x50] sm:$0xff]   ;;  %s2067_s18 = sshll.u32 %s2602_s29, 4  ;;  %s2068_s18 = int_to_ptr.vmem [resolvable:$true] %s2067_s18 }
  0x39   :  { %2142 = vmatpush3.bf16.msra.mxu0 %v2349_v1  ;;  %v2353_v5 = vld [vmem:[%s3443_s1 + $0x10] sm:$0xff]   ;;  %v2354_v6 = vld [vmem:[%s3443_s1 + $0x58] sm:$0xff]   ;;  %v2356_v9 = vld [vmem:[%s3443_s1 + $0x60] sm:$0xff]   ;;  %v2753_v10 = vshrl.u32 %v109_v7, 7  ;;  %s2564_s20 = scalar_lea.vmem %s2068_s18, 32  ;;  %p2569_p11 = scmp.lt.s32.totalorder %s2068_s18, %s2068_s18 }
  0x3a   :  { %2143 = vmatprep.subr.bf16.mxu0 %v2350_v2  ;;  %v2355_v8 = vld [vmem:[%s3443_s1 + $0x18] sm:$0xff]   ;;  %v2357_v11 = vld [vmem:[%s3443_s1 + $0x20] sm:$0xff]   ;;  %v2358_v12 = vld [vmem:[%s3443_s1 + $0x68] sm:$0xff]   ;;  %p2565_p10 = scmp.ne.s32.totalorder %s2068_s18, %s2564_s20  ;;  %p2570_p12 = scmp.lt.s32.totalorder %s2564_s20, %s2564_s20 }
  0x3b   :  { %v93_v13 = vld [vmem:[%s3442_s0] sm:$0xff]  ;;  %v94_v14 = vld [vmem:[%s3442_s0 + $0x8] sm:$0xff]  ;;  %v100_v15 = vld [vmem:[%s3442_s0 + $0x38] sm:$0xff]  ;;  %vm111_vm0 = vcmp.lt.s32.totalorder %v2753_v10, 1  ;;  %v330_v7 = vadd.s32 24, %v2753_v10  ;;  %vm798_vm8 = vcmp.lt.s32.totalorder %v2753_v10, 2 }
  0x3c   :  { %v2359_v16 = vld [vmem:[%s3443_s1 + $0x28] sm:$0xff]   ;;  %v121_v17 = vpack.c.bf16 %v94_v14, %v93_v13  ;;  %v95_v18 = vld [vmem:[%s3442_s0 + $0x10] sm:$0xff]  ;;  %v96_v19 = vld [vmem:[%s3442_s0 + $0x18] sm:$0xff]  ;;  %v101_v21 = vrot.slane %v93_v13, 7  ;;  %v102_v22 = vrot.slane %v94_v14, 7  ;;  %v108_v23 = vrot.slane %v100_v15, 7  ;;  %p2571_p13 = por %p2570_p12, %p2569_p11 }
  0x3d   :  { %2144 = vmatpush3.bf16.msra.mxu0 %v2351_v3  ;;  %v2360_v20 = vld [vmem:[%s3443_s1 + $0x70] sm:$0xff]   ;;  %v97_v24 = vld [vmem:[%s3442_s0 + $0x20] sm:$0xff]  ;;  %v98_v25 = vld [vmem:[%s3442_s0 + $0x28] sm:$0xff]  ;;  %v103_v26 = vrot.slane %v95_v18, 7  ;;  %v104_v27 = vrot.slane %v96_v19, 7  ;;  %v123_v36 = vpack.c.bf16 %v96_v19, %v95_v18  ;;  %v2826_v14 = vand.u32 31, %v330_v7 }
  0x3e   :  { %2145 = vmatprep.subr.bf16.mxu0 %v2352_v4  ;;  %295 = vmatprep.mubr.bf16.mxu0 %v121_v17  ;;  %v2361_v28 = vld [vmem:[%s3443_s1 + $0x30] sm:$0xff]   ;;  %v105_v29 = vrot.slane %v97_v24, 7  ;;  %v106_v30 = vrot.slane %v98_v25, 7  ;;  %v2362_v31 = vld [vmem:[%s3443_s1 + $0x78] sm:$0xff]   ;;  %v118_v33 = vsel %vm111_vm0, %v101_v21, %v102_v22  ;;  %v119_v34 = vsel %vm111_vm0, %v108_v23, %v101_v21  ;;  %v2364_v50 = vld [vmem:[#allocation2 + $0x40] sm:$0xff]   ;;  %p2572_p0 = pnand %p2571_p13, %p2565_p10 }
  0x3f   :  { %v2363_v32 = vld [vmem:[%s3443_s1 + $0x38] sm:$0xff]   ;;  %v120_v35 = vpack.c.bf16 %v118_v33, %v119_v34  ;;  %v116_v37 = vsel %vm111_vm0, %v103_v26, %v104_v27  ;;  %v117_v38 = vsel %vm111_vm0, %v102_v22, %v103_v26  ;;  %v125_v40 = vpack.c.bf16 %v98_v25, %v97_v24  ;;  %v99_v43 = vld [vmem:[%s3442_s0 + $0x30] sm:$0xff]  ;;  %v2365_v51 = vld [vmem:[#allocation2] sm:$0xff]   ;;  %2181 = vmatprep.subr.bf16.mxu1 %v2364_v50 }
  0x40   :  { %v122_v39 = vpack.c.bf16 %v116_v37, %v117_v38  ;;  %v114_v41 = vsel %vm111_vm0, %v105_v29, %v106_v30  ;;  %v115_v42 = vsel %vm111_vm0, %v104_v27, %v105_v29  ;;  %v107_v45 = vrot.slane %v99_v43, 7  ;;  %2182 = vmatpush3.bf16.msra.mxu1 %v2365_v51  ;;  %v2366_v52 = vld [vmem:[#allocation2 + $0x48] sm:$0xff]   ;;  %v2368_v54 = vld [vmem:[#allocation2 + $0x50] sm:$0xff]   ;;  %v2370_v56 = vld [vmem:[#allocation2 + $0x58] sm:$0xff]  }
  0x41   :  { %2146 = vmatpush3.bf16.msra.mxu0 %v2353_v5  ;;  %v124_v44 = vpack.c.bf16 %v114_v41, %v115_v42  ;;  %v127_v46 = vpack.c.bf16 %v100_v15, %v99_v43  ;;  %v2367_v53 = vld [vmem:[#allocation2 + $0x8] sm:$0xff]   ;;  %2183 = vmatprep.subr.bf16.mxu1 %v2366_v52  ;;  %v2369_v55 = vld [vmem:[#allocation2 + $0x10] sm:$0xff]   ;;  %v2371_v57 = vld [vmem:[#allocation2 + $0x18] sm:$0xff]   ;;  %vm442_vm1 = vcmp.lt.s32.totalorder %v2826_v14, 25  ;;  %v2599_v26 = vmov 0.0  }
  0x42   :  { %2147 = vmatprep.subr.bf16.mxu0 %v2354_v6  ;;  %v112_v47 = vsel %vm111_vm0, %v107_v45, %v108_v23  ;;  %v113_v48 = vsel %vm111_vm0, %v106_v30, %v107_v45  ;;  %v2372_v58 = vld [vmem:[#allocation2 + $0x60] sm:$0xff]   ;;  %v2374_v60 = vld [vmem:[#allocation2 + $0x68] sm:$0xff]   ;;  %v2376_v62 = vld [vmem:[#allocation2 + $0x70] sm:$0xff]   ;;  %v2836_v27 = vsel %vm442_vm1, 1.0, %v2599_v26  ;;  %vm1018_vm12 = vcmp.lt.s32.totalorder %v2826_v14, 27 }
  0x43   :  { %v126_v49 = vpack.c.bf16 %v112_v47, %v113_v48  ;;  %v2373_v59 = vld [vmem:[#allocation2 + $0x20] sm:$0xff]   ;;  %v2375_v61 = vld [vmem:[#allocation2 + $0x28] sm:$0xff]   ;;  %v2377_v63 = vld [vmem:[#allocation2 + $0x30] sm:$0xff]  }
  0x44   :  { %2184 = vmatpush3.bf16.msra.mxu1 %v2367_v53  ;;  %v2378_v0 = vld [vmem:[#allocation2 + $0x78] sm:$0xff]   ;;  %v2077_v3 = vld [vmem:[%s3444_s2] ss:$0 sm:$0xff] }
  0x45   :  { %2148 = vmatpush3.bf16.msra.mxu0 %v2355_v8  ;;  %2185 = vmatprep.subr.bf16.mxu1 %v2368_v54  ;;  %v2379_v1 = vld [vmem:[#allocation2 + $0x38] sm:$0xff]  }
  0x46   :  { %2149 = vmatprep.subr.bf16.mxu0 %v2356_v9 }
  0x48   :  { %2186 = vmatpush3.bf16.msra.mxu1 %v2369_v55 }
  0x49   :  { %2150 = vmatpush3.bf16.msra.mxu0 %v2357_v11  ;;  %2187 = vmatprep.subr.bf16.mxu1 %v2370_v56 }
  0x4a   :  { %2151 = vmatprep.subr.bf16.mxu0 %v2358_v12 }
  0x4c   :  { %2188 = vmatpush3.bf16.msra.mxu1 %v2371_v57 }
  0x4d   :  { %2152 = vmatpush3.bf16.msra.mxu0 %v2359_v16  ;;  %2189 = vmatprep.subr.bf16.mxu1 %v2372_v58 }
  0x4e   :  { %2153 = vmatprep.subr.bf16.mxu0 %v2360_v20 }
  0x50   :  { %2190 = vmatpush3.bf16.msra.mxu1 %v2373_v59 }
  0x51   :  { %2154 = vmatpush3.bf16.msra.mxu0 %v2361_v28  ;;  %2191 = vmatprep.subr.bf16.mxu1 %v2374_v60 }
  0x52   :  { %2155 = vmatprep.subr.bf16.mxu0 %v2362_v31 }
  0x54   :  { %2192 = vmatpush3.bf16.msra.mxu1 %v2375_v61 }
  0x55   :  { %2156 = vmatpush3.bf16.msra.mxu0 %v2363_v32  ;;  %2193 = vmatprep.subr.bf16.mxu1 %v2376_v62 }
  0x58   :  { %296 = vmatmul.mubr.bf16.vlgmr.msra.gmra.mrb[0].mxu0 %v120_v35  ;;  %2194 = vmatpush3.bf16.msra.mxu1 %v2377_v63  ;;  %v334_v35 = vadd.s32 56, %v2753_v10 }
  0x59   :  { %303 = vmatprep.mubr.bf16.mxu0 %v123_v36  ;;  %2195 = vmatprep.subr.bf16.mxu1 %v2378_v0 }
  0x5c   :  { %2196 = vmatpush3.bf16.msra.mxu1 %v2379_v1 }
  0x60   :  { %304 = vmatmul.mubr.bf16.gmra.mrb[4].mxu0 %v122_v39 }
  0x61   :  { %311 = vmatprep.mubr.bf16.mxu0 %v125_v40 }
  0x68   :  { %312 = vmatmul.mubr.bf16.gmra.mrb[8].mxu0 %v124_v44  ;;  %v2849_v44 = vand.u32 31, %v334_v35 }
  0x69   :  { %319 = vmatprep.mubr.bf16.mxu0 %v127_v46 }
  0x6a   :  { %vm446_vm2 = vcmp.lt.s32.totalorder %v2849_v44, 25  ;;  %vm1022_vm13 = vcmp.lt.s32.totalorder %v2849_v44, 27 }
  0x6b   :  { %v2855_v60 = vsel %vm446_vm2, 1.0, %v2599_v26 }
  0x70   :  { %320 = vmatmul.mubr.bf16.gmra.mrb[12].mxu0 %v126_v49 }
 0x12b   :  { %v2157_v2 = vpop.f32.mrb[0].mxu0 }
 0x12c   :  { %v2158_v4 = vpop.f32.mrb[1].mxu0 }
 0x12d   :  { %v2159_v5 = vadd.f32 %v2158_v4, %v2157_v2  ;;  %v2160_v6 = vpop.f32.mrb[2].mxu0 }
 0x12e   :  { %v2161_v8 = vpop.f32.mrb[3].mxu0 }
 0x12f   :  { %v2821_v9 = vadd.f32 %v2159_v5, %v2077_v3  ;;  %v2162_v11 = vadd.f32 %v2161_v8, %v2160_v6 }
 0x131   :  { %v471_v12 = vmul.f32 0.0, %v2821_v9  ;;  %v2824_v13 = vadd.f32 %v2162_v11, %v2077_v3 }
 0x133   :  { %v493_v15 = vmul.f32 %v471_v12, %v2821_v9  ;;  %v479_v16 = vadd.f32 %v471_v12, %v2824_v13  ;;  %v494_v17 = vmul.f32 %v2824_v13, %v2824_v13  ;;  %v2163_v18 = vpop.f32.mrb[4].mxu0 }
 0x134   :  { %v2164_v19 = vpop.f32.mrb[5].mxu0 }
 0x135   :  { %v501_v20 = vadd.f32 %v494_v17, %v493_v15  ;;  %v2165_v21 = vadd.f32 %v2164_v19, %v2163_v18  ;;  %v2166_v22 = vpop.f32.mrb[6].mxu0 }
 0x136   :  { %v2167_v23 = vpop.f32.mrb[7].mxu0 }
 0x137   :  { %v2833_v24 = vadd.f32 %v2165_v21, %v2077_v3  ;;  %v2168_v25 = vadd.f32 %v2167_v23, %v2166_v22 }
 0x139   :  { %v480_v28 = vadd.f32 %v479_v16, %v2833_v24  ;;  %v495_v29 = vmul.f32 %v2833_v24, %v2833_v24  ;;  %v2841_v30 = vadd.f32 %v2168_v25, %v2077_v3 }
 0x13b   :  { %v502_v31 = vadd.f32 %v501_v20, %v495_v29  ;;  %v474_v32 = vmul.f32 %v2836_v27, %v2841_v30  ;;  %v2169_v33 = vpop.f32.mrb[8].mxu0 }
 0x13c   :  { %v2170_v34 = vpop.f32.mrb[9].mxu0 }
 0x13d   :  { %v481_v36 = vadd.f32 %v480_v28, %v474_v32  ;;  %v496_v37 = vmul.f32 %v474_v32, %v2841_v30  ;;  %v2171_v38 = vadd.f32 %v2170_v34, %v2169_v33  ;;  %v2172_v39 = vpop.f32.mrb[10].mxu0 }
 0x13e   :  { %v2173_v40 = vpop.f32.mrb[11].mxu0 }
 0x13f   :  { %v503_v41 = vadd.f32 %v502_v31, %v496_v37  ;;  %v2847_v42 = vadd.f32 %v2171_v38, %v2077_v3  ;;  %v2174_v43 = vadd.f32 %v2173_v40, %v2172_v39  ;;  %v2096_v40 = vld [vmem:[%s3445_s3] ss:$0 sm:$0xff] }
 0x141   :  { %v475_v45 = vmul.f32 0.0, %v2847_v42  ;;  %v317_v46 = vadd.f32 %v2174_v43, %v2077_v3 }
 0x143   :  { %v497_v47 = vmul.f32 %v475_v45, %v2847_v42  ;;  %v482_v48 = vadd.f32 %v481_v36, %v475_v45  ;;  %v2175_v49 = vpop.f32.mrb[12].mxu0  ;;  %v498_v53 = vmul.f32 %v317_v46, %v317_v46 }
 0x144   :  { %v2176_v50 = vpop.f32.mrb[13].mxu0 }
 0x145   :  { %v504_v51 = vadd.f32 %v503_v41, %v497_v47  ;;  %v483_v52 = vadd.f32 %v482_v48, %v317_v46  ;;  %v2177_v54 = vadd.f32 %v2176_v50, %v2175_v49  ;;  %v2178_v55 = vpop.f32.mrb[14].mxu0 }
 0x146   :  { %v2179_v56 = vpop.f32.mrb[15].mxu0 }
 0x147   :  { %v505_v57 = vadd.f32 %v504_v51, %v498_v53  ;;  %v322_v58 = vadd.f32 %v2177_v54, %v2077_v3  ;;  %v2180_v59 = vadd.f32 %v2179_v56, %v2178_v55 }
 0x149   :  { %v484_v61 = vadd.f32 %v483_v52, %v322_v58  ;;  %v499_v62 = vmul.f32 %v322_v58, %v322_v58  ;;  %v325_v63 = vadd.f32 %v2180_v59, %v2077_v3 }
 0x14b   :  { %v506_v0 = vadd.f32 %v505_v57, %v499_v62  ;;  %v478_v1 = vmul.f32 %v2855_v60, %v325_v63 }
 0x14d   :  { %v485_v2 = vadd.f32 %v484_v61, %v478_v1  ;;  %v500_v4 = vmul.f32 %v478_v1, %v325_v63 }
 0x14f   :  { %v486_v5 = vrot.slane %v485_v2, 4  ;;  %v507_v6 = vadd.f32 %v506_v0, %v500_v4 }
 0x151   :  { %v487_v7 = vadd.f32 %v486_v5, %v485_v2  ;;  %v508_v8 = vrot.slane %v507_v6, 4 }
 0x153   :  { %v488_v11 = vrot.slane %v487_v7, 2  ;;  %v509_v12 = vadd.f32 %v508_v8, %v507_v6 }
 0x155   :  { %v489_v15 = vadd.f32 %v488_v11, %v487_v7  ;;  %v510_v16 = vrot.slane %v509_v12, 2 }
 0x157   :  { %v490_v17 = vrot.slane %v489_v15, 1  ;;  %v511_v18 = vadd.f32 %v510_v16, %v509_v12 }
 0x159   :  { %v491_v19 = vadd.f32 %v490_v17, %v489_v15  ;;  %v512_v20 = vrot.slane %v511_v18, 1 }
 0x15b   :  { %v492_v21 = vmul.f32 0.029411765, %v491_v19  ;;  %v513_v22 = vadd.f32 %v512_v20, %v511_v18 }
 0x15d   :  { %v514_v3 = vmul.f32 0.029411765, %v513_v22  ;;  %v515_v23 = vmul.f32 %v492_v21, %v492_v21  ;;  %v525_v25 = vsub.f32 %v325_v63, %v492_v21  ;;  %v518_v28 = vsub.f32 %v2821_v9, %v492_v21 }
 0x15e   :  { %v519_v29 = vsub.f32 %v2824_v13, %v492_v21  ;;  %v520_v31 = vsub.f32 %v2833_v24, %v492_v21  ;;  %v521_v32 = vsub.f32 %v2841_v30, %v492_v21  ;;  %v522_v33 = vsub.f32 %v2847_v42, %v492_v21  ;;  %v2097_v24 = vld [vmem:[%s3446_s4] ss:$0 sm:$0xff] }
 0x15f   :  { %v516_v34 = vsub.f32 %v514_v3, %v515_v23  ;;  %v523_v35 = vsub.f32 %v317_v46, %v492_v21  ;;  %v524_v36 = vsub.f32 %v322_v58, %v492_v21 }
 0x161   :  { %v517_v37 = vmax.f32 %v516_v34, 0.0 }
 0x163   :  { %v526_v38 = vadd.f32 1e-05, %v517_v37 }
 0x165   :  { %2396 = vrsqrt.f32 %v526_v38 }
 0x16f   :  { %v2397_v39 = vpop.eup %2396 }
 0x170   :  { %v535_v9 = vmul.f32 %v2397_v39, %v525_v25  ;;  %v528_v41 = vmul.f32 %v2397_v39, %v518_v28  ;;  %v529_v13 = vmul.f32 %v2397_v39, %v519_v29  ;;  %v530_v43 = vmul.f32 %v2397_v39, %v520_v31 }
 0x171   :  { %v531_v30 = vmul.f32 %v2397_v39, %v521_v32  ;;  %v532_v42 = vmul.f32 %v2397_v39, %v522_v33  ;;  %v533_v45 = vmul.f32 %v2397_v39, %v523_v35  ;;  %v534_v46 = vmul.f32 %v2397_v39, %v524_v36 }
 0x172   :  { %v550_v47 = vmul.f32 %v2096_v40, %v535_v9  ;;  %v543_v48 = vmul.f32 %v2096_v40, %v528_v41  ;;  %v544_v49 = vmul.f32 %v2096_v40, %v529_v13  ;;  %v545_v50 = vmul.f32 %v2096_v40, %v530_v43 }
 0x173   :  { %v546_v51 = vmul.f32 %v2096_v40, %v531_v30  ;;  %v547_v1 = vmul.f32 %v2096_v40, %v532_v42  ;;  %v548_v5 = vmul.f32 %v2096_v40, %v533_v45  ;;  %v549_v8 = vmul.f32 %v2096_v40, %v534_v46 }
 0x174   :  { %v565_v52 = vadd.f32 %v2097_v24, %v550_v47  ;;  %v558_v53 = vadd.f32 %v2097_v24, %v543_v48  ;;  %v559_v54 = vadd.f32 %v2097_v24, %v544_v49  ;;  %v560_v55 = vadd.f32 %v2097_v24, %v545_v50 }
 0x175   :  { %v561_v57 = vadd.f32 %v2097_v24, %v546_v51  ;;  %v2884_v18 = vadd.f32 %v2097_v24, %v547_v1  ;;  %v2886_v21 = vadd.f32 %v2097_v24, %v548_v5  ;;  %v2888_v22 = vadd.f32 %v2097_v24, %v549_v8 }
 0x176   :  { %v2869_v56 = vmul.f32 0.70710677, %v565_v52  ;;  %v2871_v58 = vmul.f32 0.70710677, %v558_v53  ;;  %v2873_v59 = vmul.f32 0.70710677, %v559_v54 }
 0x177   :  { %v2876_v62 = vmul.f32 0.70710677, %v560_v55  ;;  %v2880_v4 = vmul.f32 0.70710677, %v561_v57  ;;  %v2891_v29 = vmul.f32 0.70710677, %v2884_v18 }
 0x178   :  { %v589_v61 = vand.u32 2147483647, %v2869_v56  ;;  %v582_v63 = vand.u32 2147483647, %v2871_v58  ;;  %v583_v0 = vand.u32 2147483647, %v2873_v59 }
 0x179   :  { %v584_v12 = vand.u32 2147483647, %v2876_v62  ;;  %v585_v15 = vand.u32 2147483647, %v2880_v4  ;;  %v2894_v31 = vmul.f32 0.70710677, %v2886_v21 }
 0x17a   :  { %v597_v2 = vmul.f32 0.3275911, %v589_v61  ;;  %v590_v6 = vmul.f32 0.3275911, %v582_v63  ;;  %v591_v7 = vmul.f32 0.3275911, %v583_v0 }
 0x17b   :  { %v592_v19 = vmul.f32 0.3275911, %v584_v12  ;;  %v593_v20 = vmul.f32 0.3275911, %v585_v15  ;;  %v701_v3 = vsub.f32 0.0, %v589_v61  ;;  %v694_v25 = vsub.f32 0.0, %v582_v63 }
 0x17c   :  { %v605_v11 = vadd.f32 1.0, %v597_v2  ;;  %v598_v16 = vadd.f32 1.0, %v590_v6  ;;  %v599_v17 = vadd.f32 1.0, %v591_v7  ;;  %v2896_v32 = vmul.f32 0.5, %v565_v52 }
 0x17d   :  { %v600_v23 = vadd.f32 1.0, %v592_v19  ;;  %v601_v28 = vadd.f32 1.0, %v593_v20  ;;  %v2898_v33 = vmul.f32 0.5, %v558_v53  ;;  %v2901_v34 = vmul.f32 0.70710677, %v2888_v22 }
 0x17e   :  { %2398 = vrcp.f32 %v605_v11  ;;  %v709_v35 = vmul.f32 %v701_v3, %v589_v61  ;;  %v586_v36 = vand.u32 2147483647, %v2891_v29  ;;  %v587_v37 = vand.u32 2147483647, %v2894_v31 }
 0x17f   :  { %2400 = vrcp.f32 %v598_v16  ;;  %v695_v38 = vsub.f32 0.0, %v583_v0  ;;  %v702_v39 = vmul.f32 %v694_v25, %v582_v63  ;;  %v588_v40 = vand.u32 2147483647, %v2901_v34 }
 0x180   :  { %2402 = vrcp.f32 %v599_v17  ;;  %v2906_v9 = vmul.f32 0.5, %v559_v54  ;;  %v696_v41 = vsub.f32 0.0, %v584_v12  ;;  %v594_v13 = vmul.f32 0.3275911, %v586_v36 }
 0x181   :  { %2404 = vrcp.f32 %v600_v23  ;;  %v595_v43 = vmul.f32 0.3275911, %v587_v37  ;;  %v2908_v24 = vmul.f32 0.5, %v560_v55  ;;  %v2910_v30 = vmul.f32 0.5, %v561_v57 }
 0x182   :  { %2406 = vrcp.f32 %v601_v28  ;;  %v697_v42 = vsub.f32 0.0, %v585_v15  ;;  %v596_v45 = vmul.f32 0.3275911, %v588_v40  ;;  %v724_v47 = vmul.f32 1.442695, %v709_v35 }
 0x183   :  { %v602_v48 = vadd.f32 1.0, %v594_v13  ;;  %v603_v49 = vadd.f32 1.0, %v595_v43  ;;  %v698_v50 = vsub.f32 0.0, %v586_v36  ;;  %v703_v53 = vmul.f32 %v695_v38, %v583_v0 }
 0x184   :  { %v710_v54 = vmul.f32 1.442695, %v702_v39  ;;  %v699_v61 = vsub.f32 0.0, %v587_v37  ;;  %v704_v63 = vmul.f32 %v696_v41, %v584_v12  ;;  %v604_v57 = vadd.f32 1.0, %v596_v45 }
 0x185   :  { %2408 = vrcp.f32 %v602_v48  ;;  %v705_v5 = vmul.f32 %v697_v42, %v585_v15  ;;  %v700_v6 = vsub.f32 0.0, %v588_v40  ;;  %v706_v11 = vmul.f32 %v698_v50, %v586_v36 }
 0x186   :  { %2410 = vrcp.f32 %v603_v49  ;;  %v712_v16 = vmul.f32 1.442695, %v703_v53  ;;  %v707_v17 = vmul.f32 %v699_v61, %v587_v37  ;;  %v714_v3 = vmul.f32 1.442695, %v704_v63 }
 0x187   :  { %2412 = vpow2.f32 %v724_v47  ;;  %v716_v28 = vmul.f32 1.442695, %v705_v5  ;;  %v708_v35 = vmul.f32 %v700_v6, %v588_v40  ;;  %v718_v37 = vmul.f32 1.442695, %v706_v11 }
 0x188   :  { %v2912_v46 = vpop.eup %2398  ;;  %2414 = vpow2.f32 %v710_v54  ;;  %v720_v43 = vmul.f32 1.442695, %v707_v17  ;;  %vm749_vm3 = vcmp.ge.f32.partialorder %v2869_v56, 0.0  ;;  %vm742_vm4 = vcmp.ge.f32.partialorder %v2871_v58, 0.0 }
 0x189   :  { %v2914_v51 = vpop.eup %2400  ;;  %v629_v52 = vmul.f32 1.0614054, %v2912_v46  ;;  %2416 = vrcp.f32 %v604_v57  ;;  %v722_v40 = vmul.f32 1.442695, %v708_v35  ;;  %vm743_vm5 = vcmp.ge.f32.partialorder %v2873_v59, 0.0 }
 0x18a   :  { %v622_v55 = vmul.f32 1.0614054, %v2914_v51  ;;  %v2918_v1 = vpop.eup %2402  ;;  %2418 = vpow2.f32 %v712_v16  ;;  %vm744_vm6 = vcmp.ge.f32.partialorder %v2876_v62, 0.0  ;;  %vm745_vm7 = vcmp.ge.f32.partialorder %v2880_v4, 0.0 }
 0x18b   :  { %v637_v2 = vadd.f32 -1.4531521, %v629_v52  ;;  %v623_v7 = vmul.f32 1.0614054, %v2918_v1  ;;  %v2922_v19 = vpop.eup %2404  ;;  %2420 = vpow2.f32 %v714_v3  ;;  %vm746_vm9 = vcmp.ge.f32.partialorder %v2891_v29, 0.0 }
 0x18c   :  { %v630_v8 = vadd.f32 -1.4531521, %v622_v55  ;;  %v2925_v15 = vpop.eup %2406  ;;  %v624_v25 = vmul.f32 1.0614054, %v2922_v19  ;;  %2422 = vpow2.f32 %v716_v28  ;;  %vm747_vm10 = vcmp.ge.f32.partialorder %v2894_v31, 0.0 }
 0x18d   :  { %v645_v0 = vmul.f32 %v2912_v46, %v637_v2  ;;  %v631_v12 = vadd.f32 -1.4531521, %v623_v7  ;;  %v625_v39 = vmul.f32 1.0614054, %v2925_v15  ;;  %2424 = vpow2.f32 %v718_v37 }
 0x18e   :  { %v638_v20 = vmul.f32 %v2914_v51, %v630_v8  ;;  %v632_v13 = vadd.f32 -1.4531521, %v624_v25  ;;  %2426 = vpow2.f32 %v720_v43  ;;  %vm748_vm11 = vcmp.ge.f32.partialorder %v2901_v34, 0.0 }
 0x18f   :  { %v653_v23 = vadd.f32 1.4214138, %v645_v0  ;;  %v639_v36 = vmul.f32 %v2918_v1, %v631_v12  ;;  %v633_v47 = vadd.f32 -1.4531521, %v625_v39  ;;  %v2933_v50 = vpop.eup %2408  ;;  %2428 = vpow2.f32 %v722_v40 }
 0x190   :  { %v646_v38 = vadd.f32 1.4214138, %v638_v20  ;;  %v640_v49 = vmul.f32 %v2922_v19, %v632_v13  ;;  %v2937_v61 = vpop.eup %2410  ;;  %v626_v57 = vmul.f32 1.0614054, %v2933_v50 }
 0x191   :  { %v661_v41 = vmul.f32 %v2912_v46, %v653_v23  ;;  %v647_v42 = vadd.f32 1.4214138, %v639_v36  ;;  %v641_v54 = vmul.f32 %v2925_v15, %v633_v47  ;;  %v2413_v2 = vpop.eup %2412  ;;  %v627_v8 = vmul.f32 1.0614054, %v2937_v61 }
 0x192   :  { %v654_v45 = vmul.f32 %v2914_v51, %v646_v38  ;;  %v648_v63 = vadd.f32 1.4214138, %v640_v49  ;;  %v2415_v11 = vpop.eup %2414  ;;  %v634_v17 = vadd.f32 -1.4531521, %v626_v57 }
 0x193   :  { %v669_v48 = vadd.f32 -0.28449672, %v661_v41  ;;  %v655_v52 = vmul.f32 %v2918_v1, %v647_v42  ;;  %v649_v7 = vadd.f32 1.4214138, %v641_v54  ;;  %v2944_v12 = vpop.eup %2416  ;;  %v635_v25 = vadd.f32 -1.4531521, %v627_v8 }
 0x194   :  { %v662_v53 = vadd.f32 -0.28449672, %v654_v45  ;;  %v656_v16 = vmul.f32 %v2922_v19, %v648_v63  ;;  %v642_v36 = vmul.f32 %v2933_v50, %v634_v17  ;;  %v628_v38 = vmul.f32 1.0614054, %v2944_v12  ;;  %v2419_v43 = vpop.eup %2418 }
 0x195   :  { %v677_v55 = vmul.f32 %v2912_v46, %v669_v48  ;;  %v663_v5 = vadd.f32 -0.28449672, %v655_v52  ;;  %v657_v23 = vmul.f32 %v2925_v15, %v649_v7  ;;  %v643_v13 = vmul.f32 %v2937_v61, %v635_v25  ;;  %v2421_v48 = vpop.eup %2420 }
 0x196   :  { %v670_v6 = vmul.f32 %v2914_v51, %v662_v53  ;;  %v664_v35 = vadd.f32 -0.28449672, %v656_v16  ;;  %v636_v47 = vadd.f32 -1.4531521, %v628_v38  ;;  %v2423_v54 = vpop.eup %2422 }
 0x197   :  { %v685_v0 = vadd.f32 0.2548296, %v677_v55  ;;  %v671_v20 = vmul.f32 %v2918_v1, %v663_v5  ;;  %v665_v41 = vadd.f32 -0.28449672, %v657_v23  ;;  %v651_v53 = vadd.f32 1.4214138, %v643_v13 }
 0x198   :  { %v678_v3 = vadd.f32 0.2548296, %v670_v6  ;;  %v672_v45 = vmul.f32 %v2922_v19, %v664_v35  ;;  %v644_v57 = vmul.f32 %v2944_v12, %v636_v47 }
 0x199   :  { %v693_v28 = vmul.f32 %v2912_v46, %v685_v0  ;;  %v679_v39 = vadd.f32 0.2548296, %v671_v20  ;;  %v650_v46 = vadd.f32 1.4214138, %v642_v36  ;;  %v673_v52 = vmul.f32 %v2925_v15, %v665_v41 }
 0x19a   :  { %v686_v37 = vmul.f32 %v2914_v51, %v678_v3  ;;  %v680_v55 = vadd.f32 0.2548296, %v672_v45  ;;  %v659_v8 = vmul.f32 %v2937_v61, %v651_v53  ;;  %v652_v17 = vadd.f32 1.4214138, %v644_v57 }
 0x19b   :  { %v733_v42 = vmul.f32 %v2413_v2, %v693_v28  ;;  %v687_v49 = vmul.f32 %v2918_v1, %v679_v39  ;;  %v658_v63 = vmul.f32 %v2933_v50, %v650_v46  ;;  %v2425_v2 = vpop.eup %2424  ;;  %v681_v7 = vadd.f32 0.2548296, %v673_v52 }
 0x19c   :  { %v726_v40 = vmul.f32 %v2415_v11, %v686_v37  ;;  %v2427_v1 = vpop.eup %2426  ;;  %v688_v0 = vmul.f32 %v2922_v19, %v680_v55  ;;  %v667_v25 = vadd.f32 -0.28449672, %v659_v8  ;;  %v660_v39 = vmul.f32 %v2944_v12, %v652_v17 }
 0x19d   :  { %v741_v51 = vsub.f32 1.0, %v733_v42  ;;  %v727_v5 = vmul.f32 %v2419_v43, %v687_v49  ;;  %v666_v16 = vadd.f32 -0.28449672, %v658_v63  ;;  %v689_v23 = vmul.f32 %v2925_v15, %v681_v7  ;;  %v2429_v28 = vpop.eup %2428 }
 0x19e   :  { %v734_v6 = vsub.f32 1.0, %v726_v40  ;;  %v728_v36 = vmul.f32 %v2421_v48, %v688_v0  ;;  %v675_v42 = vmul.f32 %v2937_v61, %v667_v25  ;;  %v668_v48 = vadd.f32 -0.28449672, %v660_v39 }
 0x19f   :  { %v757_v11 = vsub.f32 0.0, %v741_v51  ;;  %v735_v20 = vsub.f32 1.0, %v727_v5  ;;  %v674_v38 = vmul.f32 %v2933_v50, %v666_v16  ;;  %v729_v13 = vmul.f32 %v2423_v54, %v689_v23 }
 0x1a0   :  { %v750_v3 = vsub.f32 0.0, %v734_v6  ;;  %v736_v15 = vsub.f32 1.0, %v728_v36  ;;  %v683_v52 = vadd.f32 0.2548296, %v675_v42  ;;  %v676_v55 = vmul.f32 %v2944_v12, %v668_v48 }
 0x1a1   :  { %v765_v35 = vsel %vm749_vm3, %v741_v51, %v757_v11  ;;  %v751_v19 = vsub.f32 0.0, %v735_v20  ;;  %v682_v45 = vadd.f32 0.2548296, %v674_v38  ;;  %v737_v47 = vsub.f32 1.0, %v729_v13 }
 0x1a2   :  { %v773_v37 = vadd.f32 1.0, %v765_v35  ;;  %v758_v41 = vsel %vm742_vm4, %v734_v6, %v750_v3  ;;  %v752_v58 = vsub.f32 0.0, %v736_v15  ;;  %v691_v57 = vmul.f32 %v2937_v61, %v683_v52 }
 0x1a3   :  { %v766_v43 = vadd.f32 1.0, %v758_v41  ;;  %v759_v46 = vsel %vm743_vm5, %v735_v20, %v751_v19  ;;  %v753_v54 = vsub.f32 0.0, %v737_v47  ;;  %v690_v51 = vmul.f32 %v2933_v50, %v682_v45 }
 0x1a4   :  { %v781_v56 = vmul.f32 %v773_v37, %v2896_v32  ;;  %v767_v49 = vadd.f32 1.0, %v759_v46  ;;  %v760_v59 = vsel %vm744_vm6, %v736_v15, %v752_v58  ;;  %v684_v17 = vadd.f32 0.2548296, %v676_v55  ;;  %v2380_v55 = vld [vmem:[#allocation5 + $0x40] sm:$0xff]  }
 0x1a5   :  { %v774_v40 = vmul.f32 %v766_v43, %v2898_v33  ;;  %v761_v5 = vsel %vm745_vm7, %v737_v47, %v753_v54  ;;  %v730_v6 = vmul.f32 %v2425_v2, %v690_v51  ;;  %2221 = vmatprep.subr.bf16.mxu0 %v2380_v55  ;;  %vm1374_vm3 = vcmp.lt.s32.totalorder %v2753_v10, 4 }
 0x1a6   :  { %v2979_v53 = vmul.f32 %v2855_v60, %v781_v56  ;;  %v775_v32 = vmul.f32 %v767_v49, %v2906_v9  ;;  %v768_v60 = vadd.f32 1.0, %v760_v59  ;;  %v769_v11 = vadd.f32 1.0, %v761_v5  ;;  %v2383_v59 = vld [vmem:[#allocation5 + $0x8] sm:$0xff]   ;;  %v2386_v5 = vld [vmem:[#allocation5 + $0x58] sm:$0xff]  }
 0x1a7   :  { %v782_v63 = vmul.f32 0.0, %v774_v40  ;;  %v731_v9 = vmul.f32 %v2427_v1, %v691_v57  ;;  %v738_v16 = vsub.f32 1.0, %v730_v6  ;;  %v692_v1 = vmul.f32 %v2944_v12, %v684_v17  ;;  %v2384_v57 = vld [vmem:[#allocation5 + $0x50] sm:$0xff]  }
 0x1a8   :  { %v797_v33 = vrot.slane %v2979_v53, 6  ;;  %v791_v8 = vrot.slane %v775_v32, 6  ;;  %v776_v0 = vmul.f32 %v768_v60, %v2908_v24  ;;  %v777_v4 = vmul.f32 %v769_v11, %v2910_v30  ;;  %v2388_v60 = vld [vmem:[#allocation5 + $0x60] sm:$0xff]  }
 0x1a9   :  { %v790_v7 = vrot.slane %v782_v63, 6  ;;  %v808_v50 = vpack.c.bf16 %v775_v32, %v782_v63  ;;  %v739_v3 = vsub.f32 1.0, %v731_v9  ;;  %v754_v23 = vsub.f32 0.0, %v738_v16  ;;  %v2381_v32 = vld [vmem:[#allocation5] sm:$0xff]   ;;  %v2382_v63 = vld [vmem:[#allocation5 + $0x48] sm:$0xff]  }
 0x1aa   :  { %v792_v2 = vrot.slane %v776_v0, 6  ;;  %v785_v25 = vmul.f32 %v2836_v27, %v777_v4  ;;  %v570_v24 = vmul.f32 0.5, %v2884_v18  ;;  %v732_v19 = vmul.f32 %v2429_v28, %v692_v1  ;;  %2222 = vmatpush3.bf16.msra.mxu0 %v2381_v32 }
 0x1ab   :  { %982 = vmatprep.mubr.bf16.mxu1 %v808_v50  ;;  %v805_v62 = vsel %vm798_vm8, %v790_v7, %v791_v8  ;;  %v806_v61 = vsel %vm798_vm8, %v797_v33, %v790_v7  ;;  %v755_v36 = vsub.f32 0.0, %v739_v3  ;;  %v762_v30 = vsel %vm746_vm9, %v738_v16, %v754_v23  ;;  %2223 = vmatprep.subr.bf16.mxu0 %v2382_v63  ;;  %v3020_v7 = vld [vmem:[%s3448_s6] ss:$0 sm:$0xff]  ;;  %v2390_v16 = vld [vmem:[#allocation5 + $0x68] sm:$0xff]  }
 0x1ac   :  { %v807_v20 = vpack.c.bf16 %v805_v62, %v806_v61  ;;  %v804_v35 = vsel %vm798_vm8, %v791_v8, %v792_v2  ;;  %v793_v38 = vrot.slane %v785_v25, 6  ;;  %v810_v39 = vpack.c.bf16 %v785_v25, %v776_v0  ;;  %v2389_v0 = vld [vmem:[#allocation5 + $0x20] sm:$0xff]  }
 0x1ad   :  { %v770_v37 = vadd.f32 1.0, %v762_v30  ;;  %v571_v27 = vmul.f32 0.5, %v2886_v21  ;;  %v763_v41 = vsel %vm747_vm10, %v739_v3, %v755_v36  ;;  %v740_v13 = vsub.f32 1.0, %v732_v19 }
 0x1ae   :  { %983 = vmatmul.mubr.bf16.vlgmr.msra.gmra.mrb[0].mxu1 %v807_v20  ;;  %v803_v18 = vsel %vm798_vm8, %v792_v2, %v793_v38  ;;  %v771_v29 = vadd.f32 1.0, %v763_v41  ;;  %v572_v21 = vmul.f32 0.5, %v2888_v22  ;;  %2224 = vmatpush3.bf16.msra.mxu0 %v2383_v59  ;;  %v2391_v20 = vld [vmem:[#allocation5 + $0x28] sm:$0xff]   ;;  %v2392_v2 = vld [vmem:[#allocation5 + $0x70] sm:$0xff]   ;;  %v3038_v41 = vsel %vm1018_vm12, 1.0, %v2599_v26 }
 0x1af   :  { %990 = vmatprep.mubr.bf16.mxu1 %v810_v39  ;;  %v778_v12 = vmul.f32 %v770_v37, %v570_v24  ;;  %v809_v43 = vpack.c.bf16 %v803_v18, %v804_v35  ;;  %v756_v31 = vsub.f32 0.0, %v740_v13  ;;  %2225 = vmatprep.subr.bf16.mxu0 %v2384_v57  ;;  %v2394_v37 = vld [vmem:[#allocation5 + $0x78] sm:$0xff]   ;;  %vm2601_vm7 = vmmov 0  }
 0x1b0   :  { %v779_v15 = vmul.f32 %v771_v29, %v571_v27  ;;  %vm1598_vm9 = vcmp.lt.s32.totalorder %v2849_v44, 31 }
 0x1b1   :  { %v786_v42 = vmul.f32 0.0, %v778_v12  ;;  %v764_v28 = vsel %vm748_vm11, %v740_v13, %v756_v31  ;;  %v2395_v13 = vld [vmem:[#allocation5 + $0x38] sm:$0xff]   ;;  %v3275_v44 = vsel %vm1598_vm9, 1.0, %v2599_v26 }
 0x1b2   :  { %v795_v56 = vrot.slane %v779_v15, 6  ;;  %v772_v47 = vadd.f32 1.0, %v764_v28 }
 0x1b3   :  { %v794_v45 = vrot.slane %v786_v42, 6  ;;  %v812_v46 = vpack.c.bf16 %v779_v15, %v786_v42 }
 0x1b4   :  { %v780_v58 = vmul.f32 %v772_v47, %v572_v21 }
 0x1b5   :  { %v801_v48 = vsel %vm798_vm8, %v794_v45, %v795_v56  ;;  %v802_v49 = vsel %vm798_vm8, %v793_v38, %v794_v45  ;;  %v2393_v38 = vld [vmem:[#allocation5 + $0x30] sm:$0xff]  }
 0x1b6   :  { %991 = vmatmul.mubr.bf16.gmra.mrb[4].mxu1 %v809_v43  ;;  %v811_v40 = vpack.c.bf16 %v801_v48, %v802_v49  ;;  %v796_v52 = vrot.slane %v780_v58, 6  ;;  %v814_v34 = vpack.c.bf16 %v2979_v53, %v780_v58  ;;  %v2385_v53 = vld [vmem:[#allocation5 + $0x10] sm:$0xff]  }
 0x1b7   :  { %998 = vmatprep.mubr.bf16.mxu1 %v812_v46  ;;  %2226 = vmatpush3.bf16.msra.mxu0 %v2385_v53 }
 0x1b8   :  { %v799_v54 = vsel %vm798_vm8, %v796_v52, %v797_v33  ;;  %v800_v51 = vsel %vm798_vm8, %v795_v56, %v796_v52  ;;  %v2387_v33 = vld [vmem:[#allocation5 + $0x18] sm:$0xff]   ;;  %2227 = vmatprep.subr.bf16.mxu0 %v2386_v5  ;;  %vm1594_vm8 = vcmp.lt.s32.totalorder %v2826_v14, 31 }
 0x1b9   :  { %v813_v22 = vpack.c.bf16 %v799_v54, %v800_v51 }
 0x1bb   :  { %2228 = vmatpush3.bf16.msra.mxu0 %v2387_v33 }
 0x1bc   :  { %2229 = vmatprep.subr.bf16.mxu0 %v2388_v60  ;;  %v3058_v60 = vsel %vm1022_vm13, 1.0, %v2599_v26 }
 0x1be   :  { %999 = vmatmul.mubr.bf16.gmra.mrb[8].mxu1 %v811_v40 }
 0x1bf   :  { %1006 = vmatprep.mubr.bf16.mxu1 %v814_v34  ;;  %2230 = vmatpush3.bf16.msra.mxu0 %v2389_v0 }
 0x1c0   :  { %2231 = vmatprep.subr.bf16.mxu0 %v2390_v16 }
 0x1c3   :  { %2232 = vmatpush3.bf16.msra.mxu0 %v2391_v20 }
 0x1c4   :  { %2233 = vmatprep.subr.bf16.mxu0 %v2392_v2 }
 0x1c6   :  { %1007 = vmatmul.mubr.bf16.gmra.mrb[12].mxu1 %v813_v22 }
 0x1c7   :  { %2234 = vmatpush3.bf16.msra.mxu0 %v2393_v38  ;;  %2310 = vmatprep.mubr.msk.f32.mxu1 %vm2601_vm7, %v2599_v26 }
 0x1c8   :  { %2235 = vmatprep.subr.bf16.mxu0 %v2394_v37 }
 0x1cb   :  { %2236 = vmatpush3.bf16.msra.mxu0 %v2395_v13 }
 0x281   :  { %v2197_v6 = vpop.f32.mrb[0].mxu1 }
 0x282   :  { %v2198_v8 = vpop.f32.mrb[1].mxu1 }
 0x283   :  { %v2199_v50 = vadd.f32 %v2198_v8, %v2197_v6  ;;  %v2200_v11 = vpop.f32.mrb[2].mxu1 }
 0x284   :  { %v2201_v9 = vpop.f32.mrb[3].mxu1 }
 0x285   :  { %v3023_v17 = vadd.f32 %v2199_v50, %v3020_v7  ;;  %v2202_v62 = vadd.f32 %v2201_v9, %v2200_v11 }
 0x287   :  { %v1047_v61 = vmul.f32 0.0, %v3023_v17  ;;  %v3027_v4 = vadd.f32 %v2202_v62, %v3020_v7 }
 0x289   :  { %v1069_v3 = vmul.f32 %v1047_v61, %v3023_v17  ;;  %v1055_v23 = vadd.f32 %v1047_v61, %v3027_v4  ;;  %v1070_v25 = vmul.f32 %v3027_v4, %v3027_v4  ;;  %v2203_v24 = vpop.f32.mrb[4].mxu1 }
 0x28a   :  { %v2204_v1 = vpop.f32.mrb[5].mxu1 }
 0x28b   :  { %v1077_v35 = vadd.f32 %v1070_v25, %v1069_v3  ;;  %v2205_v36 = vadd.f32 %v2204_v1, %v2203_v24  ;;  %v2206_v30 = vpop.f32.mrb[6].mxu1 }
 0x28c   :  { %v2207_v39 = vpop.f32.mrb[7].mxu1 }
 0x28d   :  { %v3035_v19 = vadd.f32 %v2205_v36, %v3020_v7  ;;  %v2208_v27 = vadd.f32 %v2207_v39, %v2206_v30 }
 0x28f   :  { %v1056_v18 = vadd.f32 %v1055_v23, %v3035_v19  ;;  %v1071_v29 = vmul.f32 %v3035_v19, %v3035_v19  ;;  %v3044_v12 = vadd.f32 %v2208_v27, %v3020_v7 }
 0x291   :  { %v1078_v43 = vadd.f32 %v1077_v35, %v1071_v29  ;;  %v1050_v15 = vmul.f32 %v3038_v41, %v3044_v12  ;;  %v2209_v42 = vpop.f32.mrb[8].mxu1 }
 0x292   :  { %v2210_v31 = vpop.f32.mrb[9].mxu1 }
 0x293   :  { %v1057_v45 = vadd.f32 %v1056_v18, %v1050_v15  ;;  %v1072_v56 = vmul.f32 %v1050_v15, %v3044_v12  ;;  %v2211_v46 = vadd.f32 %v2210_v31, %v2209_v42  ;;  %v2212_v28 = vpop.f32.mrb[10].mxu1 }
 0x294   :  { %v2213_v21 = vpop.f32.mrb[11].mxu1 }
 0x295   :  { %v1079_v47 = vadd.f32 %v1078_v43, %v1072_v56  ;;  %v3050_v48 = vadd.f32 %v2211_v46, %v3020_v7  ;;  %v2214_v49 = vadd.f32 %v2213_v21, %v2212_v28  ;;  %v2117_v21 = vld [vmem:[%s3449_s7] ss:$0 sm:$0xff] }
 0x297   :  { %v1051_v40 = vmul.f32 0.0, %v3050_v48  ;;  %v1004_v58 = vadd.f32 %v2214_v49, %v3020_v7 }
 0x299   :  { %v1073_v52 = vmul.f32 %v1051_v40, %v3050_v48  ;;  %v1058_v34 = vadd.f32 %v1057_v45, %v1051_v40  ;;  %v2215_v54 = vpop.f32.mrb[12].mxu1  ;;  %v1074_v32 = vmul.f32 %v1004_v58, %v1004_v58 }
 0x29a   :  { %v2216_v51 = vpop.f32.mrb[13].mxu1 }
 0x29b   :  { %v1080_v22 = vadd.f32 %v1079_v47, %v1073_v52  ;;  %v1059_v55 = vadd.f32 %v1058_v34, %v1004_v58  ;;  %v2217_v63 = vadd.f32 %v2216_v51, %v2215_v54  ;;  %v2218_v59 = vpop.f32.mrb[14].mxu1 }
 0x29c   :  { %v2219_v57 = vpop.f32.mrb[15].mxu1 }
 0x29d   :  { %v1081_v53 = vadd.f32 %v1080_v22, %v1074_v32  ;;  %v1009_v5 = vadd.f32 %v2217_v63, %v3020_v7  ;;  %v2220_v33 = vadd.f32 %v2219_v57, %v2218_v59 }
 0x29f   :  { %v1060_v6 = vadd.f32 %v1059_v55, %v1009_v5  ;;  %v1075_v8 = vmul.f32 %v1009_v5, %v1009_v5  ;;  %v1012_v50 = vadd.f32 %v2220_v33, %v3020_v7 }
 0x2a1   :  { %v1082_v11 = vadd.f32 %v1081_v53, %v1075_v8  ;;  %v1054_v0 = vmul.f32 %v3058_v60, %v1012_v50 }
 0x2a3   :  { %v1061_v9 = vadd.f32 %v1060_v6, %v1054_v0  ;;  %v1076_v16 = vmul.f32 %v1054_v0, %v1012_v50 }
 0x2a5   :  { %v1062_v62 = vrot.slane %v1061_v9, 4  ;;  %v1083_v61 = vadd.f32 %v1082_v11, %v1076_v16 }
 0x2a7   :  { %v1063_v20 = vadd.f32 %v1062_v62, %v1061_v9  ;;  %v1084_v2 = vrot.slane %v1083_v61, 4 }
 0x2a9   :  { %v1064_v3 = vrot.slane %v1063_v20, 2  ;;  %v1085_v23 = vadd.f32 %v1084_v2, %v1083_v61 }
 0x2ab   :  { %v1065_v25 = vadd.f32 %v1064_v3, %v1063_v20  ;;  %v1086_v24 = vrot.slane %v1085_v23, 2 }
 0x2ad   :  { %v1066_v1 = vrot.slane %v1065_v25, 1  ;;  %v1087_v35 = vadd.f32 %v1086_v24, %v1085_v23 }
 0x2af   :  { %v1067_v36 = vadd.f32 %v1066_v1, %v1065_v25  ;;  %v1088_v30 = vrot.slane %v1087_v35, 1 }
 0x2b1   :  { %v1068_v38 = vmul.f32 0.02631579, %v1067_v36  ;;  %v1089_v39 = vadd.f32 %v1088_v30, %v1087_v35 }
 0x2b3   :  { %v1090_v7 = vmul.f32 0.02631579, %v1089_v39  ;;  %v1091_v37 = vmul.f32 %v1068_v38, %v1068_v38  ;;  %v1101_v27 = vsub.f32 %v1012_v50, %v1068_v38  ;;  %v1094_v18 = vsub.f32 %v3023_v17, %v1068_v38 }
 0x2b4   :  { %v1095_v29 = vsub.f32 %v3027_v4, %v1068_v38  ;;  %v1096_v13 = vsub.f32 %v3035_v19, %v1068_v38  ;;  %v1097_v43 = vsub.f32 %v3044_v12, %v1068_v38  ;;  %v1098_v15 = vsub.f32 %v3050_v48, %v1068_v38  ;;  %v2118_v19 = vld [vmem:[%s3450_s8] ss:$0 sm:$0xff] }
 0x2b5   :  { %v1092_v42 = vsub.f32 %v1090_v7, %v1091_v37  ;;  %v1099_v31 = vsub.f32 %v1004_v58, %v1068_v38  ;;  %v1100_v45 = vsub.f32 %v1009_v5, %v1068_v38 }
 0x2b7   :  { %v1093_v56 = vmax.f32 %v1092_v42, 0.0 }
 0x2b9   :  { %v1102_v46 = vadd.f32 1e-05, %v1093_v56 }
 0x2bb   :  { %2430 = vrsqrt.f32 %v1102_v46 }
 0x2c5   :  { %v2431_v28 = vpop.eup %2430 }
 0x2c6   :  { %v1111_v17 = vmul.f32 %v2431_v28, %v1101_v27  ;;  %v1104_v47 = vmul.f32 %v2431_v28, %v1094_v18  ;;  %v1105_v4 = vmul.f32 %v2431_v28, %v1095_v29  ;;  %v1106_v49 = vmul.f32 %v2431_v28, %v1096_v13 }
 0x2c7   :  { %v1107_v12 = vmul.f32 %v2431_v28, %v1097_v43  ;;  %v1108_v48 = vmul.f32 %v2431_v28, %v1098_v15  ;;  %v1109_v40 = vmul.f32 %v2431_v28, %v1099_v31  ;;  %v1110_v58 = vmul.f32 %v2431_v28, %v1100_v45 }
 0x2c8   :  { %v1126_v52 = vmul.f32 %v2117_v21, %v1111_v17  ;;  %v1119_v34 = vmul.f32 %v2117_v21, %v1104_v47  ;;  %v1120_v54 = vmul.f32 %v2117_v21, %v1105_v4  ;;  %v1121_v51 = vmul.f32 %v2117_v21, %v1106_v49 }
 0x2c9   :  { %v1122_v22 = vmul.f32 %v2117_v21, %v1107_v12  ;;  %v1123_v0 = vmul.f32 %v2117_v21, %v1108_v48  ;;  %v1124_v62 = vmul.f32 %v2117_v21, %v1109_v40  ;;  %v1125_v2 = vmul.f32 %v2117_v21, %v1110_v58 }
 0x2ca   :  { %v1141_v55 = vadd.f32 %v2118_v19, %v1126_v52  ;;  %v1134_v32 = vadd.f32 %v2118_v19, %v1119_v34  ;;  %v1135_v63 = vadd.f32 %v2118_v19, %v1120_v54  ;;  %v1136_v59 = vadd.f32 %v2118_v19, %v1121_v51 }
 0x2cb   :  { %v1137_v53 = vadd.f32 %v2118_v19, %v1122_v22  ;;  %v3088_v35 = vadd.f32 %v2118_v19, %v1123_v0  ;;  %v3090_v38 = vadd.f32 %v2118_v19, %v1124_v62  ;;  %v3092_v39 = vadd.f32 %v2118_v19, %v1125_v2 }
 0x2cc   :  { %v3073_v57 = vmul.f32 0.70710677, %v1141_v55  ;;  %v3075_v5 = vmul.f32 0.70710677, %v1134_v32  ;;  %v3077_v33 = vmul.f32 0.70710677, %v1135_v63 }
 0x2cd   :  { %v3080_v8 = vmul.f32 0.70710677, %v1136_v59  ;;  %v3084_v16 = vmul.f32 0.70710677, %v1137_v53  ;;  %v3095_v29 = vmul.f32 0.70710677, %v3088_v35 }
 0x2ce   :  { %v1165_v6 = vand.u32 2147483647, %v3073_v57  ;;  %v1158_v50 = vand.u32 2147483647, %v3075_v5  ;;  %v1159_v11 = vand.u32 2147483647, %v3077_v33 }
 0x2cf   :  { %v1160_v23 = vand.u32 2147483647, %v3080_v8  ;;  %v1161_v25 = vand.u32 2147483647, %v3084_v16  ;;  %v3098_v13 = vmul.f32 0.70710677, %v3090_v38 }
 0x2d0   :  { %v1173_v9 = vmul.f32 0.3275911, %v1165_v6  ;;  %v1166_v61 = vmul.f32 0.3275911, %v1158_v50  ;;  %v1167_v20 = vmul.f32 0.3275911, %v1159_v11 }
 0x2d1   :  { %v1168_v36 = vmul.f32 0.3275911, %v1160_v23  ;;  %v1169_v30 = vmul.f32 0.3275911, %v1161_v25  ;;  %v1277_v7 = vsub.f32 0.0, %v1165_v6  ;;  %v1270_v27 = vsub.f32 0.0, %v1158_v50 }
 0x2d2   :  { %v1181_v3 = vadd.f32 1.0, %v1173_v9  ;;  %v1174_v24 = vadd.f32 1.0, %v1166_v61  ;;  %v1175_v1 = vadd.f32 1.0, %v1167_v20  ;;  %v3100_v43 = vmul.f32 0.5, %v1141_v55 }
 0x2d3   :  { %v1176_v37 = vadd.f32 1.0, %v1168_v36  ;;  %v1177_v18 = vadd.f32 1.0, %v1169_v30  ;;  %v3102_v15 = vmul.f32 0.5, %v1134_v32  ;;  %v3105_v42 = vmul.f32 0.70710677, %v3092_v39 }
 0x2d4   :  { %2432 = vrcp.f32 %v1181_v3  ;;  %v1285_v31 = vmul.f32 %v1277_v7, %v1165_v6  ;;  %v1162_v45 = vand.u32 2147483647, %v3095_v29  ;;  %v1163_v56 = vand.u32 2147483647, %v3098_v13 }
 0x2d5   :  { %2434 = vrcp.f32 %v1174_v24  ;;  %v1271_v46 = vsub.f32 0.0, %v1159_v11  ;;  %v1278_v28 = vmul.f32 %v1270_v27, %v1158_v50  ;;  %v1164_v21 = vand.u32 2147483647, %v3105_v42 }
 0x2d6   :  { %2436 = vrcp.f32 %v1175_v1  ;;  %v3110_v17 = vmul.f32 0.5, %v1135_v63  ;;  %v1272_v47 = vsub.f32 0.0, %v1160_v23  ;;  %v1170_v4 = vmul.f32 0.3275911, %v1162_v45 }
 0x2d7   :  { %2438 = vrcp.f32 %v1176_v37  ;;  %v1171_v49 = vmul.f32 0.3275911, %v1163_v56  ;;  %v3112_v19 = vmul.f32 0.5, %v1136_v59  ;;  %v3114_v12 = vmul.f32 0.5, %v1137_v53 }
 0x2d8   :  { %2440 = vrcp.f32 %v1177_v18  ;;  %v1273_v48 = vsub.f32 0.0, %v1161_v25  ;;  %v1172_v40 = vmul.f32 0.3275911, %v1164_v21  ;;  %v1300_v52 = vmul.f32 1.442695, %v1285_v31 }
 0x2d9   :  { %v1178_v34 = vadd.f32 1.0, %v1170_v4  ;;  %v1179_v54 = vadd.f32 1.0, %v1171_v49  ;;  %v1274_v51 = vsub.f32 0.0, %v1162_v45  ;;  %v1279_v32 = vmul.f32 %v1271_v46, %v1159_v11 }
 0x2da   :  { %v1286_v63 = vmul.f32 1.442695, %v1278_v28  ;;  %v1275_v6 = vsub.f32 0.0, %v1163_v56  ;;  %v1280_v50 = vmul.f32 %v1272_v47, %v1160_v23  ;;  %v1180_v53 = vadd.f32 1.0, %v1172_v40 }
 0x2db   :  { %2442 = vrcp.f32 %v1178_v34  ;;  %v1281_v62 = vmul.f32 %v1273_v48, %v1161_v25  ;;  %v1276_v61 = vsub.f32 0.0, %v1164_v21  ;;  %v1282_v3 = vmul.f32 %v1274_v51, %v1162_v45 }
 0x2dc   :  { %2444 = vrcp.f32 %v1179_v54  ;;  %v1288_v24 = vmul.f32 1.442695, %v1279_v32  ;;  %v1283_v1 = vmul.f32 %v1275_v6, %v1163_v56  ;;  %v1290_v7 = vmul.f32 1.442695, %v1280_v50 }
 0x2dd   :  { %2446 = vpow2.f32 %v1300_v52  ;;  %v1292_v18 = vmul.f32 1.442695, %v1281_v62  ;;  %v1284_v31 = vmul.f32 %v1276_v61, %v1164_v21  ;;  %v1294_v56 = vmul.f32 1.442695, %v1282_v3 }
 0x2de   :  { %v3116_v58 = vpop.eup %2432  ;;  %2448 = vpow2.f32 %v1286_v63  ;;  %v1296_v49 = vmul.f32 1.442695, %v1283_v1  ;;  %vm1325_vm14 = vcmp.ge.f32.partialorder %v3073_v57, 0.0  ;;  %vm1318_vm15 = vcmp.ge.f32.partialorder %v3075_v5, 0.0 }
 0x2df   :  { %v3118_v22 = vpop.eup %2434  ;;  %v1205_v55 = vmul.f32 1.0614054, %v3116_v58  ;;  %2450 = vrcp.f32 %v1180_v53  ;;  %v1298_v21 = vmul.f32 1.442695, %v1284_v31  ;;  %vm1319_vm0 = vcmp.ge.f32.partialorder %v3077_v33, 0.0 }
 0x2e0   :  { %v1198_v59 = vmul.f32 1.0614054, %v3118_v22  ;;  %v3122_v0 = vpop.eup %2436  ;;  %2452 = vpow2.f32 %v1288_v24  ;;  %vm1320_vm1 = vcmp.ge.f32.partialorder %v3080_v8, 0.0  ;;  %vm1321_vm2 = vcmp.ge.f32.partialorder %v3084_v16, 0.0 }
 0x2e1   :  { %v1213_v9 = vadd.f32 -1.4531521, %v1205_v55  ;;  %v1199_v20 = vmul.f32 1.0614054, %v3122_v0  ;;  %v3126_v36 = vpop.eup %2438  ;;  %2454 = vpow2.f32 %v1290_v7  ;;  %vm1322_vm4 = vcmp.ge.f32.partialorder %v3095_v29, 0.0 }
 0x2e2   :  { %v1206_v2 = vadd.f32 -1.4531521, %v1198_v59  ;;  %v3129_v25 = vpop.eup %2440  ;;  %v1200_v27 = vmul.f32 1.0614054, %v3126_v36  ;;  %2456 = vpow2.f32 %v1292_v18  ;;  %vm1323_vm5 = vcmp.ge.f32.partialorder %v3098_v13, 0.0 }
 0x2e3   :  { %v1221_v11 = vmul.f32 %v3116_v58, %v1213_v9  ;;  %v1207_v23 = vadd.f32 -1.4531521, %v1199_v20  ;;  %v1201_v28 = vmul.f32 1.0614054, %v3129_v25  ;;  %2458 = vpow2.f32 %v1294_v56 }
 0x2e4   :  { %v1214_v30 = vmul.f32 %v3118_v22, %v1206_v2  ;;  %v1208_v4 = vadd.f32 -1.4531521, %v1200_v27  ;;  %2460 = vpow2.f32 %v1296_v49  ;;  %vm1324_vm6 = vcmp.ge.f32.partialorder %v3105_v42, 0.0 }
 0x2e5   :  { %v1229_v37 = vadd.f32 1.4214138, %v1221_v11  ;;  %v1215_v45 = vmul.f32 %v3122_v0, %v1207_v23  ;;  %v1209_v52 = vadd.f32 -1.4531521, %v1201_v28  ;;  %v3137_v51 = vpop.eup %2442  ;;  %2462 = vpow2.f32 %v1298_v21 }
 0x2e6   :  { %v1222_v46 = vadd.f32 1.4214138, %v1214_v30  ;;  %v1216_v54 = vmul.f32 %v3126_v36, %v1208_v4  ;;  %v3141_v6 = vpop.eup %2444  ;;  %v1202_v53 = vmul.f32 1.0614054, %v3137_v51 }
 0x2e7   :  { %v1237_v47 = vmul.f32 %v3116_v58, %v1229_v37  ;;  %v1223_v48 = vadd.f32 1.4214138, %v1215_v45  ;;  %v1217_v63 = vmul.f32 %v3129_v25, %v1209_v52  ;;  %v2447_v9 = vpop.eup %2446  ;;  %v1203_v2 = vmul.f32 1.0614054, %v3141_v6 }
 0x2e8   :  { %v1230_v40 = vmul.f32 %v3118_v22, %v1222_v46  ;;  %v1224_v50 = vadd.f32 1.4214138, %v1216_v54  ;;  %v2449_v3 = vpop.eup %2448  ;;  %v1210_v1 = vadd.f32 -1.4531521, %v1202_v53 }
 0x2e9   :  { %v1245_v34 = vadd.f32 -0.28449672, %v1237_v47  ;;  %v1231_v55 = vmul.f32 %v3122_v0, %v1223_v48  ;;  %v1225_v20 = vadd.f32 1.4214138, %v1217_v63  ;;  %v3148_v23 = vpop.eup %2450  ;;  %v1211_v27 = vadd.f32 -1.4531521, %v1203_v2 }
 0x2ea   :  { %v1238_v32 = vadd.f32 -0.28449672, %v1230_v40  ;;  %v1232_v24 = vmul.f32 %v3126_v36, %v1224_v50  ;;  %v1218_v45 = vmul.f32 %v3137_v51, %v1210_v1  ;;  %v1204_v46 = vmul.f32 1.0614054, %v3148_v23  ;;  %v2453_v49 = vpop.eup %2452 }
 0x2eb   :  { %v1253_v59 = vmul.f32 %v3116_v58, %v1245_v34  ;;  %v1239_v62 = vadd.f32 -0.28449672, %v1231_v55  ;;  %v1233_v37 = vmul.f32 %v3129_v25, %v1225_v20  ;;  %v1219_v4 = vmul.f32 %v3141_v6, %v1211_v27  ;;  %v2455_v34 = vpop.eup %2454 }
 0x2ec   :  { %v1246_v61 = vmul.f32 %v3118_v22, %v1238_v32  ;;  %v1240_v31 = vadd.f32 -0.28449672, %v1232_v24  ;;  %v1212_v52 = vadd.f32 -1.4531521, %v1204_v46  ;;  %v2457_v63 = vpop.eup %2456 }
 0x2ed   :  { %v1261_v11 = vadd.f32 0.2548296, %v1253_v59  ;;  %v1247_v30 = vmul.f32 %v3122_v0, %v1239_v62  ;;  %v1241_v47 = vadd.f32 -0.28449672, %v1233_v37  ;;  %v1227_v32 = vadd.f32 1.4214138, %v1219_v4 }
 0x2ee   :  { %v1254_v7 = vadd.f32 0.2548296, %v1246_v61  ;;  %v1248_v40 = vmul.f32 %v3126_v36, %v1240_v31  ;;  %v1220_v53 = vmul.f32 %v3148_v23, %v1212_v52 }
 0x2ef   :  { %v1269_v18 = vmul.f32 %v3116_v58, %v1261_v11  ;;  %v1255_v28 = vadd.f32 0.2548296, %v1247_v30  ;;  %v1226_v58 = vadd.f32 1.4214138, %v1218_v45  ;;  %v1249_v55 = vmul.f32 %v3129_v25, %v1241_v47 }
 0x2f0   :  { %v1262_v56 = vmul.f32 %v3118_v22, %v1254_v7  ;;  %v1256_v59 = vadd.f32 0.2548296, %v1248_v40  ;;  %v1235_v2 = vmul.f32 %v3141_v6, %v1227_v32  ;;  %v1228_v1 = vadd.f32 1.4214138, %v1220_v53 }
 0x2f1   :  { %v1309_v48 = vmul.f32 %v2447_v9, %v1269_v18  ;;  %v1263_v54 = vmul.f32 %v3122_v0, %v1255_v28  ;;  %v1234_v50 = vmul.f32 %v3137_v51, %v1226_v58  ;;  %v2459_v9 = vpop.eup %2458  ;;  %v1257_v20 = vadd.f32 0.2548296, %v1249_v55 }
 0x2f2   :  { %v1302_v21 = vmul.f32 %v2449_v3, %v1262_v56  ;;  %v2461_v0 = vpop.eup %2460  ;;  %v1264_v11 = vmul.f32 %v3126_v36, %v1256_v59  ;;  %v1243_v27 = vadd.f32 -0.28449672, %v1235_v2  ;;  %v1236_v28 = vmul.f32 %v3148_v23, %v1228_v1 }
 0x2f3   :  { %v1317_v22 = vsub.f32 1.0, %v1309_v48  ;;  %v1303_v62 = vmul.f32 %v2453_v49, %v1263_v54  ;;  %v1242_v24 = vadd.f32 -0.28449672, %v1234_v50  ;;  %v1265_v37 = vmul.f32 %v3129_v25, %v1257_v20  ;;  %v2463_v18 = vpop.eup %2462 }
 0x2f4   :  { %v1310_v61 = vsub.f32 1.0, %v1302_v21  ;;  %v1304_v45 = vmul.f32 %v2455_v34, %v1264_v11  ;;  %v1251_v48 = vmul.f32 %v3141_v6, %v1243_v27  ;;  %v1244_v34 = vadd.f32 -0.28449672, %v1236_v28 }
 0x2f5   :  { %v1333_v3 = vsub.f32 0.0, %v1317_v22  ;;  %v1311_v30 = vsub.f32 1.0, %v1303_v62  ;;  %v1250_v46 = vmul.f32 %v3137_v51, %v1242_v24  ;;  %v1305_v4 = vmul.f32 %v2457_v63, %v1265_v37 }
 0x2f6   :  { %v1326_v7 = vsub.f32 0.0, %v1310_v61  ;;  %v1312_v25 = vsub.f32 1.0, %v1304_v45  ;;  %v1259_v55 = vadd.f32 0.2548296, %v1251_v48  ;;  %v1252_v59 = vmul.f32 %v3148_v23, %v1244_v34 }
 0x2f7   :  { %v1341_v31 = vsel %vm1325_vm14, %v1317_v22, %v1333_v3  ;;  %v1327_v36 = vsub.f32 0.0, %v1311_v30  ;;  %v1258_v40 = vadd.f32 0.2548296, %v1250_v46  ;;  %v1313_v52 = vsub.f32 1.0, %v1305_v4 }
 0x2f8   :  { %v1349_v56 = vadd.f32 1.0, %v1341_v31  ;;  %v1334_v47 = vsel %vm1318_vm15, %v1310_v61, %v1326_v7  ;;  %v1328_v5 = vsub.f32 0.0, %v1312_v25  ;;  %v1267_v53 = vmul.f32 %v3141_v6, %v1259_v55 }
 0x2f9   :  { %v1342_v49 = vadd.f32 1.0, %v1334_v47  ;;  %v1335_v58 = vsel %vm1319_vm0, %v1311_v30, %v1327_v36  ;;  %v1329_v63 = vsub.f32 0.0, %v1313_v52  ;;  %v1266_v22 = vmul.f32 %v3137_v51, %v1258_v40 }
 0x2fa   :  { %v1357_v57 = vmul.f32 %v1349_v56, %v3100_v43  ;;  %v1343_v54 = vadd.f32 1.0, %v1335_v58  ;;  %v1336_v33 = vsel %vm1320_vm1, %v1312_v25, %v1328_v5  ;;  %v1260_v1 = vadd.f32 0.2548296, %v1252_v59 }
 0x2fb   :  { %v1350_v21 = vmul.f32 %v1342_v49, %v3102_v15  ;;  %v1337_v62 = vsel %vm1321_vm2, %v1313_v52, %v1329_v63  ;;  %v1306_v61 = vmul.f32 %v2459_v9, %v1266_v22  ;;  %vm1987_vm2 = vcmask 1041409  }
 0x2fc   :  { %v3183_v32 = vmul.f32 %v3058_v60, %v1357_v57  ;;  %v1351_v43 = vmul.f32 %v1343_v54, %v3110_v17  ;;  %v1344_v60 = vadd.f32 1.0, %v1336_v33  ;;  %v1345_v3 = vadd.f32 1.0, %v1337_v62  ;;  %v1962_v62 = vld [vmem:[#allocation7] sm:$0xff] }
 0x2fd   :  { %v1358_v50 = vmul.f32 0.0, %v1350_v21  ;;  %v1307_v17 = vmul.f32 %v2461_v0, %v1267_v53  ;;  %v1314_v24 = vsub.f32 1.0, %v1306_v61  ;;  %v1268_v0 = vmul.f32 %v3148_v23, %v1260_v1  ;;  %v1967_v1 = vld [vmem:[#allocation7 + $0x28] sm:$0xff] }
 0x2fe   :  { %v1373_v15 = vrot.slane %v3183_v32, 4  ;;  %v1367_v2 = vrot.slane %v1351_v43, 4  ;;  %v1352_v11 = vmul.f32 %v1344_v60, %v3112_v19  ;;  %v1353_v16 = vmul.f32 %v1345_v3, %v3114_v12  ;;  %v1963_v60 = vld [vmem:[#allocation7 + $0x8] sm:$0xff]  ;;  %v1964_v3 = vld [vmem:[#allocation7 + $0x10] sm:$0xff] }
 0x2ff   :  { %v1366_v20 = vrot.slane %v1358_v50, 4  ;;  %v1384_v51 = vpack.c.bf16 %v1351_v43, %v1358_v50  ;;  %v1315_v7 = vsub.f32 1.0, %v1307_v17  ;;  %v1330_v37 = vsub.f32 0.0, %v1314_v24  ;;  %v3224_v43 = vld [vmem:[%s3452_s10] ss:$0 sm:$0xff] }
 0x300   :  { %v1368_v9 = vrot.slane %v1352_v11, 4  ;;  %v1361_v27 = vmul.f32 %v3038_v41, %v1353_v16  ;;  %v1146_v19 = vmul.f32 0.5, %v3088_v35  ;;  %v1308_v36 = vmul.f32 %v2463_v18, %v1268_v0 }
 0x301   :  { %v1381_v8 = vsel %vm1374_vm3, %v1366_v20, %v1367_v2  ;;  %v1382_v6 = vsel %vm1374_vm3, %v1373_v15, %v1366_v20  ;;  %1558 = vmatprep.mubr.bf16.mxu0 %v1384_v51  ;;  %v1331_v45 = vsub.f32 0.0, %v1315_v7  ;;  %v1338_v12 = vsel %vm1322_vm4, %v1314_v24, %v1330_v37  ;;  %v1966_v24 = vld [vmem:[#allocation7 + $0x20] sm:$0xff] }
 0x302   :  { %v1383_v30 = vpack.c.bf16 %v1381_v8, %v1382_v6  ;;  %v1380_v31 = vsel %vm1374_vm3, %v1367_v2, %v1368_v9  ;;  %v1369_v46 = vrot.slane %v1361_v27, 4  ;;  %v1386_v28 = vpack.c.bf16 %v1361_v27, %v1352_v11  ;;  %v1965_v11 = vld [vmem:[#allocation7 + $0x18] sm:$0xff] }
 0x303   :  { %v1346_v56 = vadd.f32 1.0, %v1338_v12  ;;  %v1147_v41 = vmul.f32 0.5, %v3090_v38  ;;  %v1339_v47 = vsel %vm1323_vm5, %v1315_v7, %v1331_v45  ;;  %v1316_v4 = vsub.f32 1.0, %v1308_v36  ;;  %v1969_v45 = vld [vmem:[#allocation7 + $0x38] sm:$0xff] }
 0x304   :  { %1559 = vmatmul.mubr.bf16.vlgmr.msra.gmra.mrb[16].mxu0 %v1383_v30  ;;  %v1379_v35 = vsel %vm1374_vm3, %v1368_v9, %v1369_v46  ;;  %v1347_v29 = vadd.f32 1.0, %v1339_v47  ;;  %v1148_v38 = vmul.f32 0.5, %v3092_v39  ;;  %v2314_v61 = vpack.c.bf16 %v1963_v60, %v1962_v62  ;;  %v1970_v47 = vld [vmem:[#allocation7 + $0x40] sm:$0xff] }
 0x305   :  { %1566 = vmatprep.mubr.bf16.mxu0 %v1386_v28  ;;  %v1354_v23 = vmul.f32 %v1346_v56, %v1146_v19  ;;  %v1385_v49 = vpack.c.bf16 %v1379_v35, %v1380_v31  ;;  %v1332_v13 = vsub.f32 0.0, %v1316_v4  ;;  %v2600_v20 = vmov 0.0|0.0   ;;  %v1968_v31 = vld [vmem:[#allocation7 + $0x30] sm:$0xff]  ;;  %v1971_v35 = vld [vmem:[#allocation7 + $0x48] sm:$0xff] }
 0x306   :  { %v1355_v25 = vmul.f32 %v1347_v29, %v1147_v41  ;;  %2313 = vmatprep.subr.bf16.mxu1 %v2600_v20  ;;  %v2317_v17 = vpack.c.bf16 %v1965_v11, %v1964_v3  ;;  %v2320_v19 = vpack.c.bf16 %v1967_v1, %v1966_v24  ;;  %v3246_v28 = vsel %vm1594_vm8, 1.0, %v2599_v26  ;;  %v1977_v3 = vld [vmem:[#allocation7 + $0x78] sm:$0xff] }
 0x307   :  { %v1362_v48 = vmul.f32 0.0, %v1354_v23  ;;  %v1340_v18 = vsel %vm1324_vm6, %v1316_v4, %v1332_v13  ;;  %2315 = vmatpush3.bf16.msra.mxu1 %v2314_v61  ;;  %v2323_v41 = vpack.c.bf16 %v1969_v45, %v1968_v31 }
 0x308   :  { %v1371_v57 = vrot.slane %v1355_v25, 4  ;;  %v1348_v52 = vadd.f32 1.0, %v1340_v18  ;;  %2316 = vmatprep.subr.bf16.mxu1 %v2600_v20  ;;  %v1972_v18 = vld [vmem:[#allocation7 + $0x50] sm:$0xff] }
 0x309   :  { %v1370_v40 = vrot.slane %v1362_v48, 4  ;;  %v1388_v58 = vpack.c.bf16 %v1355_v25, %v1362_v48 }
 0x30a   :  { %v1356_v5 = vmul.f32 %v1348_v52, %v1148_v38  ;;  %v1973_v38 = vld [vmem:[#allocation7 + $0x58] sm:$0xff] }
 0x30b   :  { %v1377_v34 = vsel %vm1374_vm3, %v1370_v40, %v1371_v57  ;;  %v1378_v54 = vsel %vm1374_vm3, %v1369_v46, %v1370_v40  ;;  %2318 = vmatpush3.bf16.msra.mxu1 %v2317_v17 }
 0x30c   :  { %1567 = vmatmul.mubr.bf16.gmra.mrb[20].mxu0 %v1385_v49  ;;  %v1387_v21 = vpack.c.bf16 %v1377_v34, %v1378_v54  ;;  %v1372_v55 = vrot.slane %v1356_v5, 4  ;;  %v1390_v42 = vpack.c.bf16 %v3183_v32, %v1356_v5  ;;  %2319 = vmatprep.subr.bf16.mxu1 %v2600_v20 }
 0x30d   :  { %1574 = vmatprep.mubr.bf16.mxu0 %v1388_v58 }
 0x30e   :  { %v1375_v63 = vsel %vm1374_vm3, %v1372_v55, %v1373_v15  ;;  %v1376_v22 = vsel %vm1374_vm3, %v1371_v57, %v1372_v55  ;;  %v2326_v57 = vpack.c.bf16 %v1971_v35, %v1970_v47  ;;  %v2329_v55 = vpack.c.bf16 %v1973_v38, %v1972_v18 }
 0x30f   :  { %v1389_v39 = vpack.c.bf16 %v1375_v63, %v1376_v22  ;;  %2321 = vmatpush3.bf16.msra.mxu1 %v2320_v19  ;;  %v1975_v63 = vld [vmem:[#allocation7 + $0x68] sm:$0xff] }
 0x310   :  { %2322 = vmatprep.subr.bf16.mxu1 %v2600_v20 }
 0x313   :  { %2324 = vmatpush3.bf16.msra.mxu1 %v2323_v41 }
 0x314   :  { %1575 = vmatmul.mubr.bf16.gmra.mrb[24].mxu0 %v1387_v21  ;;  %2325 = vmatprep.subr.bf16.mxu1 %v2600_v20 }
 0x315   :  { %1582 = vmatprep.mubr.bf16.mxu0 %v1390_v42  ;;  %v1974_v42 = vld [vmem:[#allocation7 + $0x60] sm:$0xff] }
 0x317   :  { %2327 = vmatpush3.bf16.msra.mxu1 %v2326_v57 }
 0x318   :  { %2328 = vmatprep.subr.bf16.mxu1 %v2600_v20 }
 0x31b   :  { %2330 = vmatpush3.bf16.msra.mxu1 %v2329_v55 }
 0x31c   :  { %1583 = vmatmul.mubr.bf16.gmra.mrb[28].mxu0 %v1389_v39  ;;  %2331 = vmatprep.subr.bf16.mxu1 %v2600_v20 }
 0x3d7   :  { %v2237_v59 = vpop.f32.mrb[16].mxu0 }
 0x3d8   :  { %v2238_v50 = vpop.f32.mrb[17].mxu0 }
 0x3d9   :  { %v2239_v33 = vadd.f32 %v2238_v50, %v2237_v59  ;;  %v2240_v53 = vpop.f32.mrb[18].mxu0 }
 0x3da   :  { %v2241_v32 = vpop.f32.mrb[19].mxu0 }
 0x3db   :  { %v3227_v15 = vadd.f32 %v2239_v33, %v3224_v43  ;;  %v2242_v10 = vadd.f32 %v2241_v32, %v2240_v53  ;;  %v2332_v33 = vpack.c.bf16 %v1975_v63, %v1974_v42 }
 0x3dd   :  { %v1623_v2 = vmul.f32 0.0, %v3227_v15  ;;  %v3232_v51 = vadd.f32 %v2242_v10, %v3224_v43  ;;  %2333 = vmatpush3.bf16.msra.mxu1 %v2332_v33 }
 0x3de   :  { %2334 = vmatprep.subr.bf16.mxu1 %v2600_v20 }
 0x3df   :  { %v1645_v8 = vmul.f32 %v1623_v2, %v3227_v15  ;;  %v1631_v6 = vadd.f32 %v1623_v2, %v3232_v51  ;;  %v1646_v16 = vmul.f32 %v3232_v51, %v3232_v51  ;;  %v2243_v30 = vpop.f32.mrb[20].mxu0  ;;  %v1976_v2 = vld [vmem:[#allocation7 + $0x70] sm:$0xff] }
 0x3e0   :  { %v2244_v9 = vpop.f32.mrb[21].mxu0 }
 0x3e1   :  { %v1653_v7 = vadd.f32 %v1646_v16, %v1645_v8  ;;  %v2245_v37 = vadd.f32 %v2244_v9, %v2243_v30  ;;  %v2246_v27 = vpop.f32.mrb[22].mxu0  ;;  %v2335_v16 = vpack.c.bf16 %v1977_v3, %v1976_v2 }
 0x3e2   :  { %v2247_v0 = vpop.f32.mrb[23].mxu0 }
 0x3e3   :  { %v3243_v12 = vadd.f32 %v2245_v37, %v3224_v43  ;;  %v2248_v46 = vadd.f32 %v2247_v0, %v2246_v27  ;;  %2336 = vmatpush3.bf16.msra.mxu1 %v2335_v16 }
 0x3e5   :  { %v1632_v56 = vadd.f32 %v1631_v6, %v3243_v12  ;;  %v1647_v36 = vmul.f32 %v3243_v12, %v3243_v12  ;;  %v3252_v14 = vadd.f32 %v2248_v46, %v3224_v43 }
 0x3e7   :  { %v1654_v29 = vadd.f32 %v1653_v7, %v1647_v36  ;;  %v1626_v23 = vmul.f32 %v3246_v28, %v3252_v14  ;;  %v2249_v4 = vpop.f32.mrb[24].mxu0 }
 0x3e8   :  { %v2250_v49 = vpop.f32.mrb[25].mxu0 }
 0x3e9   :  { %v1633_v25 = vadd.f32 %v1632_v56, %v1626_v23  ;;  %v1648_v48 = vmul.f32 %v1626_v23, %v3252_v14  ;;  %v2251_v13 = vadd.f32 %v2250_v49, %v2249_v4  ;;  %v2252_v40 = vpop.f32.mrb[26].mxu0 }
 0x3ea   :  { %v2253_v58 = vpop.f32.mrb[27].mxu0 }
 0x3eb   :  { %v1655_v52 = vadd.f32 %v1654_v29, %v1648_v48  ;;  %v3260_v34 = vadd.f32 %v2251_v13, %v3224_v43  ;;  %v2254_v54 = vadd.f32 %v2253_v58, %v2252_v40 }
 0x3ed   :  { %v1627_v21 = vmul.f32 0.0, %v3260_v34  ;;  %v3264_v5 = vadd.f32 %v2254_v54, %v3224_v43 }
 0x3ef   :  { %v1649_v22 = vmul.f32 %v1627_v21, %v3260_v34  ;;  %v1634_v39 = vadd.f32 %v1633_v25, %v1627_v21  ;;  %v2255_v59 = vpop.f32.mrb[28].mxu0  ;;  %v1650_v62 = vmul.f32 %v3264_v5, %v3264_v5 }
 0x3f0   :  { %v2256_v50 = vpop.f32.mrb[29].mxu0 }
 0x3f1   :  { %v1656_v53 = vadd.f32 %v1655_v52, %v1649_v22  ;;  %v1635_v32 = vadd.f32 %v1634_v39, %v3264_v5  ;;  %v2257_v60 = vadd.f32 %v2256_v50, %v2255_v59  ;;  %v2258_v10 = vpop.f32.mrb[30].mxu0 }
 0x3f2   :  { %v2259_v61 = vpop.f32.mrb[31].mxu0 }
 0x3f3   :  { %v1657_v11 = vadd.f32 %v1656_v53, %v1650_v62  ;;  %v1585_v17 = vadd.f32 %v2257_v60, %v3224_v43  ;;  %v2260_v24 = vadd.f32 %v2259_v61, %v2258_v10 }
 0x3f5   :  { %v1636_v1 = vadd.f32 %v1635_v32, %v1585_v17  ;;  %v1651_v8 = vmul.f32 %v1585_v17, %v1585_v17  ;;  %v1588_v6 = vadd.f32 %v2260_v24, %v3224_v43 }
 0x3f7   :  { %v1658_v30 = vadd.f32 %v1657_v11, %v1651_v8  ;;  %v1630_v9 = vmul.f32 %v3275_v44, %v1588_v6 }
 0x3f9   :  { %v1637_v7 = vadd.f32 %v1636_v1, %v1630_v9  ;;  %v1652_v37 = vmul.f32 %v1630_v9, %v1588_v6 }
 0x3fb   :  { %v1638_v27 = vrot.slane %v1637_v7, 4  ;;  %v1659_v19 = vadd.f32 %v1658_v30, %v1652_v37 }
 0x3fd   :  { %v1639_v0 = vadd.f32 %v1638_v27, %v1637_v7  ;;  %v1660_v31 = vrot.slane %v1659_v19, 4 }
 0x3ff   :  { %v1640_v26 = vrot.slane %v1639_v0, 2  ;;  %v1661_v45 = vadd.f32 %v1660_v31, %v1659_v19 }
 0x401   :  { %v1641_v46 = vadd.f32 %v1640_v26, %v1639_v0  ;;  %v1662_v56 = vrot.slane %v1661_v45, 2 }
 0x403   :  { %v1642_v36 = vrot.slane %v1641_v46, 1  ;;  %v1663_v43 = vadd.f32 %v1662_v56, %v1661_v45 }
 0x405   :  { %v1643_v41 = vadd.f32 %v1642_v36, %v1641_v46  ;;  %v1664_v47 = vrot.slane %v1663_v43, 1 }
 0x407   :  { %v1644_v35 = vmul.f32 0.02173913, %v1643_v41  ;;  %v1665_v20 = vadd.f32 %v1664_v47, %v1663_v43 }
 0x409   :  { %v1666_v29 = vmul.f32 0.02173913, %v1665_v20  ;;  %v1667_v23 = vmul.f32 %v1644_v35, %v1644_v35  ;;  %v1674_v4 = vsub.f32 %v3260_v34, %v1644_v35  ;;  %v1675_v49 = vsub.f32 %v3264_v5, %v1644_v35  ;;  %v2138_v34 = vld [vmem:[%s3453_s11] ss:$0 sm:$0xff] }
 0x40a   :  { %v1676_v25 = vsub.f32 %v1585_v17, %v1644_v35  ;;  %v1677_v48 = vsub.f32 %v1588_v6, %v1644_v35  ;;  %v1670_v13 = vsub.f32 %v3227_v15, %v1644_v35  ;;  %v1671_v40 = vsub.f32 %v3232_v51, %v1644_v35  ;;  %v2139_v15 = vld [vmem:[%s3454_s12] ss:$0 sm:$0xff] }
 0x40b   :  { %v1668_v57 = vsub.f32 %v1666_v29, %v1667_v23  ;;  %v1672_v58 = vsub.f32 %v3243_v12, %v1644_v35  ;;  %v1673_v18 = vsub.f32 %v3252_v14, %v1644_v35 }
 0x40d   :  { %v1669_v38 = vmax.f32 %v1668_v57, 0.0 }
 0x40f   :  { %v1678_v52 = vadd.f32 1e-05, %v1669_v38 }
 0x411   :  { %2464 = vrsqrt.f32 %v1678_v52 }
 0x41b   :  { %v2465_v54 = vpop.eup %2464 }
 0x41c   :  { %v1684_v21 = vmul.f32 %v2465_v54, %v1674_v4  ;;  %v1685_v5 = vmul.f32 %v2465_v54, %v1675_v49  ;;  %v1686_v55 = vmul.f32 %v2465_v54, %v1676_v25  ;;  %v1687_v42 = vmul.f32 %v2465_v54, %v1677_v48 }
 0x41d   :  { %v1680_v51 = vmul.f32 %v2465_v54, %v1670_v13  ;;  %v1681_v12 = vmul.f32 %v2465_v54, %v1671_v40  ;;  %v1682_v63 = vmul.f32 %v2465_v54, %v1672_v58  ;;  %v1683_v14 = vmul.f32 %v2465_v54, %v1673_v18 }
 0x41e   :  { %v1699_v22 = vmul.f32 %v2138_v34, %v1684_v21  ;;  %v1700_v39 = vmul.f32 %v2138_v34, %v1685_v5  ;;  %v1701_v59 = vmul.f32 %v2138_v34, %v1686_v55  ;;  %v1702_v50 = vmul.f32 %v2138_v34, %v1687_v42 }
 0x41f   :  { %v1695_v3 = vmul.f32 %v2138_v34, %v1680_v51  ;;  %v1696_v1 = vmul.f32 %v2138_v34, %v1681_v12  ;;  %v1697_v6 = vmul.f32 %v2138_v34, %v1682_v63  ;;  %v1698_v16 = vmul.f32 %v2138_v34, %v1683_v14 }
 0x420   :  { %v1714_v33 = vadd.f32 %v2139_v15, %v1699_v22  ;;  %v3292_v53 = vadd.f32 %v2139_v15, %v1700_v39  ;;  %v3294_v32 = vadd.f32 %v2139_v15, %v1701_v59  ;;  %v3296_v62 = vadd.f32 %v2139_v15, %v1702_v50 }
 0x421   :  { %v3313_v27 = vadd.f32 %v2139_v15, %v1695_v3  ;;  %v3315_v26 = vadd.f32 %v2139_v15, %v1696_v1  ;;  %v3317_v46 = vadd.f32 %v2139_v15, %v1697_v6  ;;  %v3319_v56 = vadd.f32 %v2139_v15, %v1698_v16 }
 0x422   :  { %v3298_v60 = vmul.f32 0.70710677, %v1714_v33  ;;  %v3301_v10 = vmul.f32 0.70710677, %v3292_v53  ;;  %v3304_v61 = vmul.f32 0.70710677, %v3294_v32 }
 0x423   :  { %v3307_v2 = vmul.f32 0.70710677, %v3296_v62  ;;  %v3322_v43 = vmul.f32 0.70710677, %v3313_v27  ;;  %v3325_v41 = vmul.f32 0.70710677, %v3315_v26 }
 0x424   :  { %v1738_v11 = vand.u32 2147483647, %v3298_v60  ;;  %v1739_v17 = vand.u32 2147483647, %v3301_v10  ;;  %v1740_v24 = vand.u32 2147483647, %v3304_v61 }
 0x425   :  { %v1741_v8 = vand.u32 2147483647, %v3307_v2  ;;  %v3328_v35 = vmul.f32 0.70710677, %v3317_v46  ;;  %v3331_v20 = vmul.f32 0.70710677, %v3319_v56 }
 0x426   :  { %v1746_v30 = vmul.f32 0.3275911, %v1738_v11  ;;  %v1747_v9 = vmul.f32 0.3275911, %v1739_v17  ;;  %v1748_v7 = vmul.f32 0.3275911, %v1740_v24 }
 0x427   :  { %v1749_v37 = vmul.f32 0.3275911, %v1741_v8  ;;  %v1850_v36 = vsub.f32 0.0, %v1738_v11  ;;  %v1851_v47 = vsub.f32 0.0, %v1739_v17  ;;  %v1852_v29 = vsub.f32 0.0, %v1740_v24 }
 0x428   :  { %v1754_v19 = vadd.f32 1.0, %v1746_v30  ;;  %v1755_v0 = vadd.f32 1.0, %v1747_v9  ;;  %v1756_v31 = vadd.f32 1.0, %v1748_v7  ;;  %v1734_v23 = vand.u32 2147483647, %v3322_v43 }
 0x429   :  { %v1757_v45 = vadd.f32 1.0, %v1749_v37  ;;  %v1735_v4 = vand.u32 2147483647, %v3325_v41  ;;  %v1736_v49 = vand.u32 2147483647, %v3328_v35  ;;  %v1853_v48 = vsub.f32 0.0, %v1741_v8 }
 0x42a   :  { %2466 = vrcp.f32 %v1754_v19  ;;  %v1737_v25 = vand.u32 2147483647, %v3331_v20  ;;  %v1858_v13 = vmul.f32 %v1850_v36, %v1738_v11  ;;  %v1742_v40 = vmul.f32 0.3275911, %v1734_v23 }
 0x42b   :  { %2468 = vrcp.f32 %v1755_v0  ;;  %v1743_v57 = vmul.f32 0.3275911, %v1735_v4  ;;  %v1859_v58 = vmul.f32 %v1851_v47, %v1739_v17  ;;  %v1744_v18 = vmul.f32 0.3275911, %v1736_v49 }
 0x42c   :  { %2470 = vrcp.f32 %v1756_v31  ;;  %v1745_v38 = vmul.f32 0.3275911, %v1737_v25  ;;  %v1846_v52 = vsub.f32 0.0, %v1734_v23  ;;  %v1860_v54 = vmul.f32 %v1852_v29, %v1740_v24 }
 0x42d   :  { %2472 = vrcp.f32 %v1757_v45  ;;  %v1750_v34 = vadd.f32 1.0, %v1742_v40  ;;  %v1751_v21 = vadd.f32 1.0, %v1743_v57  ;;  %v1847_v5 = vsub.f32 0.0, %v1735_v4 }
 0x42e   :  { %v3337_v55 = vmul.f32 0.5, %v1714_v33  ;;  %v1752_v42 = vadd.f32 1.0, %v1744_v18  ;;  %v1753_v15 = vadd.f32 1.0, %v1745_v38  ;;  %v1848_v51 = vsub.f32 0.0, %v1736_v49 }
 0x42f   :  { %v1861_v63 = vmul.f32 %v1853_v48, %v1741_v8  ;;  %v1870_v14 = vmul.f32 1.442695, %v1858_v13  ;;  %2474 = vrcp.f32 %v1750_v34  ;;  %v1849_v22 = vsub.f32 0.0, %v1737_v25 }
 0x430   :  { %v1872_v50 = vmul.f32 1.442695, %v1859_v58  ;;  %2476 = vrcp.f32 %v1751_v21  ;;  %v1854_v3 = vmul.f32 %v1846_v52, %v1734_v23  ;;  %v1874_v17 = vmul.f32 1.442695, %v1860_v54 }
 0x431   :  { %2478 = vrcp.f32 %v1752_v42  ;;  %v1855_v24 = vmul.f32 %v1847_v5, %v1735_v4  ;;  %v1856_v16 = vmul.f32 %v1848_v51, %v1736_v49  ;;  %v1876_v7 = vmul.f32 1.442695, %v1861_v63 }
 0x432   :  { %2480 = vrcp.f32 %v1753_v15  ;;  %v1857_v37 = vmul.f32 %v1849_v22, %v1737_v25  ;;  %v1862_v31 = vmul.f32 1.442695, %v1854_v3  ;;  %v3356_v13 = vmul.f32 0.5, %v3292_v53 }
 0x433   :  { %2482 = vpow2.f32 %v1870_v14  ;;  %v1864_v47 = vmul.f32 1.442695, %v1855_v24  ;;  %v1866_v4 = vmul.f32 1.442695, %v1856_v16  ;;  %v3362_v18 = vmul.f32 0.5, %v3294_v32 }
 0x434   :  { %v3339_v12 = vpop.eup %2466  ;;  %2484 = vpow2.f32 %v1872_v50  ;;  %v1868_v25 = vmul.f32 1.442695, %v1857_v37  ;;  %vm1898_vm10 = vcmp.ge.f32.partialorder %v3298_v60, 0.0  ;;  %vm1899_vm11 = vcmp.ge.f32.partialorder %v3301_v10, 0.0 }
 0x435   :  { %v3341_v39 = vpop.eup %2468  ;;  %v1778_v59 = vmul.f32 1.0614054, %v3339_v12  ;;  %2486 = vpow2.f32 %v1874_v17  ;;  %vm1900_vm12 = vcmp.ge.f32.partialorder %v3304_v61, 0.0  ;;  %vm1901_vm13 = vcmp.ge.f32.partialorder %v3307_v2, 0.0 }
 0x436   :  { %v3344_v11 = vpop.eup %2470  ;;  %v1779_v33 = vmul.f32 1.0614054, %v3341_v39  ;;  %2488 = vpow2.f32 %v1876_v7  ;;  %vm1894_vm14 = vcmp.ge.f32.partialorder %v3322_v43, 0.0  ;;  %vm1895_vm15 = vcmp.ge.f32.partialorder %v3325_v41, 0.0 }
 0x437   :  { %v3347_v1 = vpop.eup %2472  ;;  %v1780_v8 = vmul.f32 1.0614054, %v3344_v11  ;;  %v1786_v6 = vadd.f32 -1.4531521, %v1778_v59  ;;  %2490 = vpow2.f32 %v1862_v31  ;;  %vm1896_vm0 = vcmp.ge.f32.partialorder %v3328_v35, 0.0 }
 0x438   :  { %v1781_v30 = vmul.f32 1.0614054, %v3347_v1  ;;  %v1787_v9 = vadd.f32 -1.4531521, %v1779_v33  ;;  %2492 = vpow2.f32 %v1864_v47  ;;  %vm1897_vm1 = vcmp.ge.f32.partialorder %v3331_v20, 0.0 }
 0x439   :  { %v1788_v19 = vadd.f32 -1.4531521, %v1780_v8  ;;  %v1794_v0 = vmul.f32 %v3339_v12, %v1786_v6  ;;  %v3359_v58 = vpop.eup %2474  ;;  %2494 = vpow2.f32 %v1866_v4 }
 0x43a   :  { %v1789_v45 = vadd.f32 -1.4531521, %v1781_v30  ;;  %v1795_v36 = vmul.f32 %v3341_v39, %v1787_v9  ;;  %v3365_v54 = vpop.eup %2476  ;;  %v1774_v53 = vmul.f32 1.0614054, %v3359_v58  ;;  %2496 = vpow2.f32 %v1868_v25 }
 0x43b   :  { %v1796_v29 = vmul.f32 %v3344_v11, %v1788_v19  ;;  %v1802_v23 = vadd.f32 1.4214138, %v1794_v0  ;;  %v3369_v5 = vpop.eup %2478  ;;  %v1775_v32 = vmul.f32 1.0614054, %v3365_v54 }
 0x43c   :  { %v1797_v49 = vmul.f32 %v3347_v1, %v1789_v45  ;;  %v1803_v48 = vadd.f32 1.4214138, %v1795_v36  ;;  %v3373_v51 = vpop.eup %2480  ;;  %v1776_v22 = vmul.f32 1.0614054, %v3369_v5  ;;  %v1782_v59 = vadd.f32 -1.4531521, %v1774_v53 }
 0x43d   :  { %v1804_v40 = vadd.f32 1.4214138, %v1796_v29  ;;  %v1810_v57 = vmul.f32 %v3339_v12, %v1802_v23  ;;  %v1777_v33 = vmul.f32 1.0614054, %v3373_v51  ;;  %v1783_v17 = vadd.f32 -1.4531521, %v1775_v32  ;;  %v2483_v24 = vpop.eup %2482 }
 0x43e   :  { %v1805_v38 = vadd.f32 1.4214138, %v1797_v49  ;;  %v1811_v52 = vmul.f32 %v3341_v39, %v1803_v48  ;;  %v1784_v16 = vadd.f32 -1.4531521, %v1776_v22  ;;  %v1790_v30 = vmul.f32 %v3359_v58, %v1782_v59  ;;  %v2485_v9 = vpop.eup %2484 }
 0x43f   :  { %v1812_v34 = vmul.f32 %v3344_v11, %v1804_v40  ;;  %v1818_v21 = vadd.f32 -0.28449672, %v1810_v57  ;;  %v1785_v19 = vadd.f32 -1.4531521, %v1777_v33  ;;  %v1791_v0 = vmul.f32 %v3365_v54, %v1783_v17  ;;  %v2487_v31 = vpop.eup %2486 }
 0x440   :  { %v1813_v42 = vmul.f32 %v3347_v1, %v1805_v38  ;;  %v1819_v15 = vadd.f32 -0.28449672, %v1811_v52  ;;  %v1792_v47 = vmul.f32 %v3369_v5, %v1784_v16  ;;  %v1798_v29 = vadd.f32 1.4214138, %v1790_v30  ;;  %v2489_v23 = vpop.eup %2488 }
 0x441   :  { %v1820_v63 = vadd.f32 -0.28449672, %v1812_v34  ;;  %v1826_v14 = vmul.f32 %v3339_v12, %v1818_v21  ;;  %v1793_v48 = vmul.f32 %v3373_v51, %v1785_v19  ;;  %v1799_v25 = vadd.f32 1.4214138, %v1791_v0  ;;  %v2491_v40 = vpop.eup %2490 }
 0x442   :  { %v1821_v50 = vadd.f32 -0.28449672, %v1813_v42  ;;  %v1827_v3 = vmul.f32 %v3341_v39, %v1819_v15  ;;  %v1806_v52 = vmul.f32 %v3359_v58, %v1798_v29  ;;  %v2493_v34 = vpop.eup %2492 }
 0x443   :  { %v1828_v8 = vmul.f32 %v3344_v11, %v1820_v63  ;;  %v1834_v6 = vadd.f32 0.2548296, %v1826_v14  ;;  %v1801_v42 = vadd.f32 1.4214138, %v1793_v48  ;;  %v2495_v15 = vpop.eup %2494 }
 0x444   :  { %v1829_v7 = vmul.f32 %v3347_v1, %v1821_v50  ;;  %v1835_v37 = vadd.f32 0.2548296, %v1827_v3  ;;  %v1814_v22 = vadd.f32 -0.28449672, %v1806_v52 }
 0x445   :  { %v1836_v45 = vadd.f32 0.2548296, %v1828_v8  ;;  %v1842_v36 = vmul.f32 %v3339_v12, %v1834_v6  ;;  %v1800_v12 = vadd.f32 1.4214138, %v1792_v47  ;;  %v1809_v3 = vmul.f32 %v3373_v51, %v1801_v42 }
 0x446   :  { %v1837_v4 = vadd.f32 0.2548296, %v1829_v7  ;;  %v1843_v49 = vmul.f32 %v3341_v39, %v1835_v37  ;;  %v1807_v39 = vmul.f32 %v3365_v54, %v1799_v25 }
 0x447   :  { %v1844_v57 = vmul.f32 %v3344_v11, %v1836_v45  ;;  %v1882_v38 = vmul.f32 %v2483_v24, %v1842_v36  ;;  %v1808_v14 = vmul.f32 %v3369_v5, %v1800_v12  ;;  %v2497_v11 = vpop.eup %2496  ;;  %v1817_v30 = vadd.f32 -0.28449672, %v1809_v3 }
 0x448   :  { %v1845_v21 = vmul.f32 %v3347_v1, %v1837_v4  ;;  %v1883_v53 = vmul.f32 %v2485_v9, %v1843_v49  ;;  %v1815_v33 = vadd.f32 -0.28449672, %v1807_v39  ;;  %v1822_v1 = vmul.f32 %v3359_v58, %v1814_v22 }
 0x449   :  { %v1884_v32 = vmul.f32 %v2487_v31, %v1844_v57  ;;  %v1890_v63 = vsub.f32 1.0, %v1882_v38  ;;  %v1816_v8 = vadd.f32 -0.28449672, %v1808_v14  ;;  %v1825_v47 = vmul.f32 %v3373_v51, %v1817_v30 }
 0x44a   :  { %v1885_v59 = vmul.f32 %v2489_v23, %v1845_v21  ;;  %v1891_v50 = vsub.f32 1.0, %v1883_v53  ;;  %v1823_v9 = vmul.f32 %v3365_v54, %v1815_v33  ;;  %v1830_v0 = vadd.f32 0.2548296, %v1822_v1 }
 0x44b   :  { %v1892_v17 = vsub.f32 1.0, %v1884_v32  ;;  %v1906_v24 = vsub.f32 0.0, %v1890_v63  ;;  %v1824_v19 = vmul.f32 %v3369_v5, %v1816_v8  ;;  %v1833_v57 = vadd.f32 0.2548296, %v1825_v47 }
 0x44c   :  { %v1893_v6 = vsub.f32 1.0, %v1885_v59  ;;  %v1907_v16 = vsub.f32 0.0, %v1891_v50  ;;  %v1831_v4 = vadd.f32 0.2548296, %v1823_v9  ;;  %v1725_v38 = vmul.f32 0.5, %v3296_v62 }
 0x44d   :  { %v1908_v7 = vsub.f32 0.0, %v1892_v17  ;;  %v1914_v37 = vsel %vm1898_vm10, %v1890_v63, %v1906_v24  ;;  %v1832_v49 = vadd.f32 0.2548296, %v1824_v19  ;;  %v1838_v12 = vmul.f32 %v3359_v58, %v1830_v0 }
 0x44e   :  { %v1909_v31 = vsub.f32 0.0, %v1893_v6  ;;  %v1915_v45 = vsel %vm1899_vm11, %v1891_v50, %v1907_v16  ;;  %v1922_v36 = vadd.f32 1.0, %v1914_v37  ;;  %v1839_v52 = vmul.f32 %v3365_v54, %v1831_v4 }
 0x44f   :  { %v1916_v29 = vsel %vm1900_vm12, %v1892_v17, %v1908_v7  ;;  %v1923_v23 = vadd.f32 1.0, %v1915_v45  ;;  %v1840_v53 = vmul.f32 %v3369_v5, %v1832_v49  ;;  %v1841_v42 = vmul.f32 %v3373_v51, %v1833_v57 }
 0x450   :  { %v1917_v60 = vsel %vm1901_vm13, %v1893_v6, %v1909_v31  ;;  %v1924_v48 = vadd.f32 1.0, %v1916_v29  ;;  %v1930_v25 = vmul.f32 %v1922_v36, %v3337_v55  ;;  %v1878_v39 = vmul.f32 %v2491_v40, %v1838_v12 }
 0x451   :  { %v1925_v10 = vadd.f32 1.0, %v1917_v60  ;;  %v1931_v61 = vmul.f32 %v1923_v23, %v3356_v13  ;;  %v1879_v32 = vmul.f32 %v2493_v34, %v1839_v52  ;;  %v1880_v14 = vmul.f32 %v2495_v15, %v1840_v53 }
 0x452   :  { %v1938_v21 = vmul.f32 0.0, %v1930_v25  ;;  %v1932_v55 = vmul.f32 %v1924_v48, %v3362_v18  ;;  %v1881_v62 = vmul.f32 %v2497_v11, %v1841_v42  ;;  %v1886_v22 = vsub.f32 1.0, %v1878_v39 }
 0x453   :  { %v1933_v2 = vmul.f32 %v1925_v10, %v1725_v38  ;;  %v1887_v59 = vsub.f32 1.0, %v1879_v32  ;;  %v1888_v50 = vsub.f32 1.0, %v1880_v14  ;;  %v1718_v3 = vmul.f32 0.5, %v3313_v27 }
 0x454   :  { %v1951_v63 = vadd.f32 %v1938_v21, %v1931_v61  ;;  %v1889_v13 = vsub.f32 1.0, %v1881_v62  ;;  %v1902_v5 = vsub.f32 0.0, %v1886_v22  ;;  %v1719_v27 = vmul.f32 0.5, %v3315_v26 }
 0x455   :  { %v1941_v58 = vmul.f32 %v3275_v44, %v1933_v2  ;;  %v1903_v51 = vsub.f32 0.0, %v1887_v59  ;;  %v1904_v18 = vsub.f32 0.0, %v1888_v50  ;;  %v1721_v6 = vmul.f32 0.5, %v3319_v56 }
 0x456   :  { %v1952_v54 = vadd.f32 %v1951_v63, %v1932_v55  ;;  %v1905_v34 = vsub.f32 0.0, %v1889_v13  ;;  %v1910_v15 = vsel %vm1894_vm14, %v1886_v22, %v1902_v5  ;;  %v1720_v30 = vmul.f32 0.5, %v3317_v46 }
 0x457   :  { %v1911_v44 = vsel %vm1895_vm15, %v1887_v59, %v1903_v51  ;;  %v1912_v33 = vsel %vm1896_vm0, %v1888_v50, %v1904_v18  ;;  %v1918_v24 = vadd.f32 1.0, %v1910_v15 }
 0x458   :  { %v1953_v40 = vadd.f32 %v1952_v54, %v1941_v58  ;;  %v1913_v17 = vsel %vm1897_vm1, %v1889_v13, %v1905_v34  ;;  %v1919_v43 = vadd.f32 1.0, %v1911_v44  ;;  %v1920_v41 = vadd.f32 1.0, %v1912_v33 }
 0x459   :  { %v1921_v8 = vadd.f32 1.0, %v1913_v17  ;;  %v1926_v16 = vmul.f32 %v1918_v24, %v1718_v3 }
 0x45a   :  { %v1954_v11 = vrot.slane %v1953_v40, 4  ;;  %v1927_v35 = vmul.f32 %v1919_v43, %v1719_v27  ;;  %v1928_v7 = vmul.f32 %v1920_v41, %v1720_v30 }
 0x45b   :  { %v1929_v9 = vmul.f32 %v1921_v8, %v1721_v6  ;;  %v1934_v20 = vmul.f32 0.0, %v1926_v16 }
 0x45c   :  { %v1955_v1 = vadd.f32 %v1954_v11, %v1953_v40 }
 0x45d   :  { %v1942_v37 = vadd.f32 %v1934_v20, %v1927_v35  ;;  %v1937_v0 = vmul.f32 %v3246_v28, %v1929_v9  ;;  %v2140_v28 = vld [vmem:[%s3456_s14] ss:$0 sm:$0xff] }
 0x45e   :  { %v1956_v19 = vrot.slane %v1955_v1, 2 }
 0x45f   :  { %v1943_v31 = vadd.f32 %v1942_v37, %v1928_v7 }
 0x460   :  { %v1957_v26 = vadd.f32 %v1956_v19, %v1955_v1 }
 0x461   :  { %v1944_v45 = vadd.f32 %v1943_v31, %v1937_v0 }
 0x462   :  { %v1958_v29 = vrot.slane %v1957_v26, 1 }
 0x463   :  { %v1945_v36 = vrot.slane %v1944_v45, 4 }
 0x464   :  { %v1959_v4 = vadd.f32 %v1958_v29, %v1957_v26 }
 0x465   :  { %v1946_v47 = vadd.f32 %v1945_v36, %v1944_v45 }
 0x466   :  { %v1961_v46 = vmul.f32 0.04347826, %v1959_v4 }
 0x467   :  { %v1947_v23 = vrot.slane %v1946_v47, 2 }
 0x469   :  { %v1948_v56 = vadd.f32 %v1947_v23, %v1946_v47 }
 0x46b   :  { %v1949_v49 = vrot.slane %v1948_v56, 1 }
 0x46d   :  { %v1950_v60 = vadd.f32 %v1949_v49, %v1948_v56 }
 0x46f   :  { %v1960_v48 = vmul.f32 0.04347826, %v1950_v60 }
 0x471   :  { %v1988_v25 = vsel %vm1987_vm2, %v1961_v46, %v1960_v48 }
 0x472   :  { %2311 = vmatmul.mubr.f32.vlgmr.msra.gmra.mrb[16].mxu1 %v1988_v25 }
 0x545   :  { %v2056_v57 = vpop.f32.mrb[16].mxu1 }
 0x546   :  { %v2057_v38 = vadd.f32 %v2140_v28, %v2056_v57  ;;  %v2312_v10 = vpop.f32.mrb[17].mxu1 }
 0x548   :  { %2060 = vst [vmem:[#allocation8] sm:$0x3] %v2057_v38 }
 0x549   :  { %2575 = shalt.err (!%p2572_p0)
}
 0x54a   :  { %s2576_s17 = scalar_lea.hbm %s3457_s15, 32 }
 0x54b   :  { %p2577_p1 = scmp.ne.s32.totalorder %s3457_s15, %s2576_s17  ;;  %p2580_p2 = scmp.lt.u32.totalorder %s2576_s17, %s3457_s15 }
 0x54d   :  { %p2582_p3 = pnand %p2580_p2, %p2577_p1 }
 0x54f   :  { %2585 = shalt.err (!%p2582_p3)
}
 0x550   :  { %2070 = dma.vmem_to_hbm [thread:$0]  %s2068_s18, 32, %s3457_s15, [#allocation4]  }
 0x551   :  { %2590 = dma.done.wait [#allocation4], 32  }
 0x552   :  { %2591 = vsyncadd [#allocation4], 4294967264 }
 0x553   :  { %2074 = vsyncpa [#allocation3], 1 }
 0x554   :  { %2075 = vsyncpa [#allocation6], 1 }
 0x555   :  { %2076 = vsyncpa [#allocation4], 1 }

</bundles_post_ra>
